<compile_context>
chip_gen: v7x
topology: tpu7x:2x2x1
jax: 0.10.0
libtpu: 0.0.40
codegen_flags: <defaults>
</compile_context>

<pallas_src>
import functools

import jax
import jax.numpy as jnp
from jax.experimental import pallas as pl
from jax.experimental.pallas import tpu as pltpu

_EPS = 1e-5


def _round_up(x, m):
    return (x + m - 1) // m * m


def _vmem_limit_bytes():
    # Re-derive the scoped-VMEM ceiling per generation: ~44 MiB on v7x
    # (64 MiB physical / TC), ~100 MiB on v5e/v6e (128 MiB physical).
    try:
        cap = pltpu.get_tpu_info().vmem_capacity_bytes
        if cap and cap > 32 * 2**20:
            return int(min(cap - 20 * 2**20, 100 * 2**20))
    except Exception:
        pass
    return 48 * 2**20


_VMEM_LIMIT = _vmem_limit_bytes()


# ------------------------- fused matmul+BN Pallas kernel -------------------------

def _conv_mm_kernel(*refs, relu, has_res, has_row_add):
    """acc = A @ B (f32); epilogue: y = acc*scale + bias (+res) (+row_add) (+ReLU)."""
    a_ref, b_ref, s_ref, c_ref = refs[:4]
    idx = 4
    r_ref = ra_ref = None
    if has_res:
        r_ref = refs[idx]; idx += 1
    if has_row_add:
        ra_ref = refs[idx]; idx += 1
    o_ref, acc_ref = refs[idx], refs[idx + 1]

    @pl.when(pl.program_id(2) == 0)
    def _():
        acc_ref[...] = jnp.zeros_like(acc_ref)

    acc_ref[...] += jnp.dot(a_ref[...], b_ref[...],
                            preferred_element_type=jnp.float32)

    @pl.when(pl.program_id(2) == pl.num_programs(2) - 1)
    def _():
        y = acc_ref[...] * s_ref[...] + c_ref[...]
        if has_res:
            y = y + r_ref[...].astype(jnp.float32)
        if has_row_add:
            y = y + ra_ref[0]          # (1, TN) f32, broadcasts over (TM, TN)
        if relu:
            y = jnp.maximum(y, 0.0)
        o_ref[...] = y.astype(o_ref.dtype)


def _pick_tm(M):
    """(TM, Mp): prefer divisors of M (no A pad) and >=2 M tiles (v7x megacore)."""
    if M <= 1024:
        Mp = _round_up(M, 16)
        if Mp >= 256:
            return Mp // 2, Mp          # two tiles -> both v7x TensorCores busy
        return Mp, Mp
    t = 1024
    while t >= 256:
        if M % t == 0:
            return t, M                 # divisor found: no M-pad copy needed
        t -= 8
    # TODO(synk): emit im2col/reshape directly at Mp rows to avoid this pad copy.
    return 512, _round_up(M, 512)


def _largest_tile_dividing(rpi, cap=1024):
    t = min(cap, rpi)
    t -= t % 8
    while t >= 8:
        if rpi % t == 0:
            return t
        t -= 8
    return 8


def _fused_matmul(a, b, scale, bias, *, relu, residual=None, row_add=None,
                  rows_per_image=None, out_dtype=jnp.bfloat16):
    """(M, Kp) @ (Kp, Np) with fused scale/bias/residual/per-image-add/ReLU.

    a: (M, Kp) (K already padded to match b's rows), b: (Kp, Np) packed weight,
    scale/bias: (1, Np) f32, residual: optional (M, Np),
    row_add: optional (Nimg, Np) f32 added per image (rows_per_image rows each).
    """
    M, Kp = a.shape
    Kp2, Np = b.shape
    assert Kp == Kp2 and scale.shape == (1, Np) and bias.shape == (1, Np)

    if row_add is not None:
        assert rows_per_image is not None and rows_per_image % 8 == 0
        assert M % rows_per_image == 0
        TM = _largest_tile_dividing(rows_per_image)
        Mp = M                                   # TM | rows_per_image | M
    else:
        TM, Mp = _pick_tm(M)
    TK = 512 if Kp % 512 == 0 else (256 if Kp % 256 == 0 else 128)
    TN = 512 if Np % 512 == 0 else (256 if Np % 256 == 0 else 128)

    if Mp != M:
        a = jnp.pad(a, ((0, Mp - M), (0, 0)))
        if residual is not None:
            residual = jnp.pad(residual, ((0, Mp - M), (0, 0)))

    has_res = residual is not None
    has_row = row_add is not None

    in_specs = [
        pl.BlockSpec((TM, TK), lambda m, n, k: (m, k)),
        pl.BlockSpec((TK, TN), lambda m, n, k: (k, n)),
        pl.BlockSpec((1, TN), lambda m, n, k: (0, n)),
        pl.BlockSpec((1, TN), lambda m, n, k: (0, n)),
    ]
    inputs = [a, b, scale, bias]
    if has_res:
        in_specs.append(pl.BlockSpec((TM, TN), lambda m, n, k: (m, n)))
        inputs.append(residual)
    if has_row:
        rpi = rows_per_image
        in_specs.append(pl.BlockSpec((1, 1, TN),
                                     lambda m, n, k: ((m * TM) // rpi, 0, n)))
        inputs.append(row_add.reshape(-1, 1, Np))

    out = pl.pallas_call(
        functools.partial(_conv_mm_kernel, relu=relu, has_res=has_res,
                          has_row_add=has_row),
        out_shape=jax.ShapeDtypeStruct((Mp, Np), out_dtype),
        grid=(Mp // TM, Np // TN, Kp // TK),
        in_specs=in_specs,
        out_specs=pl.BlockSpec((TM, TN), lambda m, n, k: (m, n)),
        scratch_shapes=[pltpu.VMEM((TM, TN), jnp.float32)],
        compiler_params=pltpu.CompilerParams(
            dimension_semantics=("parallel", "parallel", "arbitrary"),
            vmem_limit_bytes=_VMEM_LIMIT),
    )(*inputs)
    return out[:M, :]


def pallas_matmul(a, b, *, operand_dtype=jnp.bfloat16, out_dtype=jnp.float32):
    """Plain (M,K)@(K,N) through the same fused kernel (scale=1, bias=0)."""
    M, K = a.shape
    K2, N = b.shape
    assert K == K2
    Kp, Np = _round_up(K, 128), _round_up(N, 128)
    a = a.astype(operand_dtype)
    b = b.astype(operand_dtype)
    if Kp != K:
        a = jnp.pad(a, ((0, 0), (0, Kp - K)))
        b = jnp.pad(b, ((0, Kp - K), (0, 0)))
    if Np != N:
        b = jnp.pad(b, ((0, 0), (0, Np - N)))
    out = _fused_matmul(a, b, jnp.ones((1, Np), jnp.float32),
                        jnp.zeros((1, Np), jnp.float32),
                        relu=False, out_dtype=out_dtype)
    return out[:M, :N]


# -------------------------- conv / pool / resize wrappers --------------------------

def _im2col(x, kh, kw, stride, dilation, padding, k_extra):
    """Tap-shifted slices concatenated along channels (bf16), K pre-padded."""
    N, H, W, C = x.shape
    xp = jnp.pad(x, ((0, 0), (padding, padding), (padding, padding), (0, 0)))
    Hout = (H + 2 * padding - dilation * (kh - 1) - 1) // stride + 1
    Wout = (W + 2 * padding - dilation * (kw - 1) - 1) // stride + 1
    cols = []
    for i in range(kh):
        for j in range(kw):
            hs, ws = i * dilation, j * dilation
            cols.append(xp[:, hs:hs + (Hout - 1) * stride + 1:stride,
                           ws:ws + (Wout - 1) * stride + 1:stride, :])
    if k_extra:
        cols.append(jnp.zeros((N, Hout, Wout, k_extra), x.dtype))
    # TODO(synk): replace this HBM im2col with a tap-accumulating Pallas conv.
    return jnp.concatenate(cols, axis=-1), Hout, Wout


def conv_bn(x, cp, *, stride=1, dilation=1, padding=0, relu=True,
            residual=None, row_add=None, rows_per_image=None,
            out_dtype=jnp.bfloat16):
    """Conv2d (bias-free) + folded BatchNorm (+residual/+per-image add) (+ReLU)."""
    N = x.shape[0]
    kh, kw, cin, cout = cp["kh"], cp["kw"], cp["cin"], cp["cout"]
    Kp, Np = cp["w"].shape
    xb = x.astype(jnp.bfloat16)
    if kh == 1 and kw == 1 and padding == 0:
        if stride != 1:
            xb = xb[:, ::stride, ::stride, :]
        Hout, Wout = xb.shape[1], xb.shape[2]
        if cin != Kp:
            xb = jnp.pad(xb, ((0, 0), (0, 0), (0, 0), (0, Kp - cin)))
        a = xb.reshape(N * Hout * Wout, Kp)
    else:
        cols, Hout, Wout = _im2col(xb, kh, kw, stride, dilation, padding,
                                   Kp - kh * kw * cin)
        a = cols.reshape(N * Hout * Wout, Kp)
    M = N * Hout * Wout

    res = None
    if residual is not None:
        res = residual.astype(jnp.bfloat16).reshape(M, cout)
        if cout != Np:
            res = jnp.pad(res, ((0, 0), (0, Np - cout)))
    ra = None
    if row_add is not None:
        ra = row_add.astype(jnp.float32)
        if ra.shape[1] != Np:
            ra = jnp.pad(ra, ((0, 0), (0, Np - ra.shape[1])))

    y = _fused_matmul(a, cp["w"], cp["scale"], cp["bias"], relu=relu,
                      residual=res, row_add=ra, rows_per_image=rows_per_image,
                      out_dtype=out_dtype)
    if cout != Np:
        y = y[:, :cout]
    return y.reshape(N, Hout, Wout, cout)


def maxpool2d(x, k=3, stride=2, pad=1):
    # TODO(synk): small glue op; a Pallas tap kernel would read the stem once.
    N, H, W, C = x.shape
    xp = jnp.pad(x, ((0, 0), (pad, pad), (pad, pad), (0, 0)),
                 constant_values=-jnp.inf)
    Hout = (H + 2 * pad - k) // stride + 1
    Wout = (W + 2 * pad - k) // stride + 1
    out = None
    for i in range(k):
        for j in range(k):
            p = xp[:, i:i + (Hout - 1) * stride + 1:stride,
                   j:j + (Wout - 1) * stride + 1:stride, :]
            out = p if out is None else jnp.maximum(out, p)
    return out


def _resize_matrix(in_size, out_size):
    # matches F.interpolate(mode='bilinear', align_corners=False)
    idx = jnp.arange(out_size, dtype=jnp.float32)
    src = (idx + 0.5) * (in_size / out_size) - 0.5
    src = jnp.maximum(src, 0.0)
    i0 = jnp.minimum(jnp.floor(src).astype(jnp.int32), in_size - 1)
    i1 = jnp.minimum(i0 + 1, in_size - 1)
    w1 = src - i0.astype(jnp.float32)
    w0 = 1.0 - w1
    R = jnp.zeros((out_size, in_size), jnp.float32)
    R = R.at[jnp.arange(out_size), i0].add(w0)
    R = R.at[jnp.arange(out_size), i1].add(w1)
    return R


def bilinear_resize(x, out_h, out_w, out_dtype=jnp.float32):
    """Separable bilinear resize as two Pallas matmuls (bf16 ops, f32 accum)."""
    N, H, W, C = x.shape
    Rh = _resize_matrix(H, out_h)
    Rw = _resize_matrix(W, out_w)
    t = jnp.transpose(x, (1, 0, 2, 3)).reshape(H, N * W * C)
    t = pallas_matmul(Rh, t, out_dtype=jnp.bfloat16).reshape(out_h, N, W, C)
    t = jnp.transpose(t, (2, 0, 1, 3)).reshape(W, out_h * N * C)
    t = pallas_matmul(Rw, t, out_dtype=out_dtype).reshape(out_w, out_h, N, C)
    return jnp.transpose(t, (2, 1, 0, 3))


# ------------------------ raw parameter initialization -------------------------

class _ParamGen:
    def __init__(self, seed):
        self._key = jax.random.PRNGKey(seed)

    def _next(self):
        self._key, sub = jax.random.split(self._key)
        return sub

    def conv(self, kh, kw, cin, cout):
        std = (2.0 / (kh * kw * cin)) ** 0.5
        return std * jax.random.normal(self._next(), (kh, kw, cin, cout),
                                       jnp.float32)

    def bn(self, c):
        return {"gamma": jnp.ones((c,), jnp.float32),
                "beta": jnp.zeros((c,), jnp.float32),
                "mean": jnp.zeros((c,), jnp.float32),
                "var": jnp.ones((c,), jnp.float32)}

    def bias(self, c, fan_in):
        bound = 1.0 / (fan_in ** 0.5)
        return jax.random.uniform(self._next(), (c,), jnp.float32,
                                  -bound, bound)


def _bottleneck_params(g, inplanes, planes, stride, dilation, downsample):
    p = {"stride": stride, "dilation": dilation,
         "conv1": g.conv(1, 1, inplanes, planes), "bn1": g.bn(planes),
         "conv2": g.conv(3, 3, planes, planes), "bn2": g.bn(planes),
         "conv3": g.conv(1, 1, planes, 4 * planes), "bn3": g.bn(4 * planes)}
    if downsample:
        p["dconv"] = g.conv(1, 1, inplanes, 4 * planes)
        p["dbn"] = g.bn(4 * planes)
    return p


def _make_layer(g, inplanes, planes, blocks, stride, dilate, dilation):
    previous_dilation = dilation
    if dilate:                      # replace_stride_with_dilation
        dilation *= stride
        stride = 1
    downsample = (stride != 1) or (inplanes != 4 * planes)
    params = [_bottleneck_params(g, inplanes, planes, stride,
                                 previous_dilation, downsample)]
    inplanes = 4 * planes
    for _ in range(blocks - 1):
        params.append(_bottleneck_params(g, inplanes, planes, 1, dilation, False))
    return params, inplanes, dilation


def init_params(seed=42):
    g = _ParamGen(seed)
    params = {"conv1": g.conv(7, 7, 3, 64), "bn1": g.bn(64)}
    inplanes, dilation = 64, 1
    # resnet50 with replace_stride_with_dilation = [False, True, True]
    cfg = [(64, 3, 1, False), (128, 4, 2, False),
           (256, 6, 2, True), (512, 3, 2, True)]
    layers = []
    for planes, blocks, stride, dilate in cfg:
        layer, inplanes, dilation = _make_layer(g, inplanes, planes, blocks,
                                                stride, dilate, dilation)
        layers.append(layer)
    params["layers"] = layers
    # DeepLabHead: ASPP(2048,[12,24,36]) -> 3x3 conv -> BN -> ReLU -> 1x1 conv(2)
    aspp = {"rates": (12, 24, 36),
            "c0": g.conv(1, 1, 2048, 256), "bn0": g.bn(256)}
    for i in range(3):
        aspp["c%d" % (i + 1)] = g.conv(3, 3, 2048, 256)
        aspp["bn%d" % (i + 1)] = g.bn(256)
    aspp["cpool"] = g.conv(1, 1, 2048, 256)
    aspp["bnpool"] = g.bn(256)
    aspp["cproj"] = g.conv(1, 1, 5 * 256, 256)
    aspp["bnproj"] = g.bn(256)
    params["aspp"] = aspp
    params["head_conv"] = g.conv(3, 3, 256, 256)
    params["head_bn"] = g.bn(256)
    params["cls_w"] = g.conv(1, 1, 256, 2)
    params["cls_b"] = g.bias(2, 256)
    return params


# ------------------- one-time inference-format parameter prep -------------------

def _pack_conv(w, scale, bias):
    """Reshape (kh,kw,Cin,Cout) -> (Kp,Np) bf16, pad scale/bias to (1,Np) f32."""
    kh, kw, cin, cout = w.shape
    K = kh * kw * cin
    # Pad K to 256 (fills the 256-deep v6e/v7x MXU) when the zero-column cost
    # is small; small-K layers stay at 128 so the A slab isn't inflated.
    Kp = _round_up(K, 256) if K >= 1024 else _round_up(K, 128)
    Np = _round_up(cout, 128)
    w2 = jnp.pad(w.reshape(K, cout).astype(jnp.bfloat16),
                 ((0, Kp - K), (0, Np - cout)))
    return {"w": w2,
            "scale": jnp.pad(scale.astype(jnp.float32), (0, Np - cout)).reshape(1, Np),
            "bias": jnp.pad(bias.astype(jnp.float32), (0, Np - cout)).reshape(1, Np),
            "kh": kh, "kw": kw, "cin": cin, "cout": cout}


def _fold_bn(w, bn):
    inv = bn["gamma"] / jnp.sqrt(bn["var"] + _EPS)
    return _pack_conv(w, inv, bn["beta"] - bn["mean"] * inv)


def prepare_params(raw):
    P = {"conv1": _fold_bn(raw["conv1"], raw["bn1"])}
    layers = []
    for layer in raw["layers"]:
        blocks = []
        for blk in layer:
            b = {"stride": blk["stride"], "dilation": blk["dilation"],
                 "conv1": _fold_bn(blk["conv1"], blk["bn1"]),
                 "conv2": _fold_bn(blk["conv2"], blk["bn2"]),
                 "conv3": _fold_bn(blk["conv3"], blk["bn3"])}
            if "dconv" in blk:
                b["dconv"] = _fold_bn(blk["dconv"], blk["dbn"])
            blocks.append(b)
        layers.append(blocks)
    P["layers"] = layers

    ra = raw["aspp"]
    aspp = {"rates": ra["rates"], "c0": _fold_bn(ra["c0"], ra["bn0"])}
    for i in range(3):
        aspp["c%d" % (i + 1)] = _fold_bn(ra["c%d" % (i + 1)], ra["bn%d" % (i + 1)])
    aspp["cpool"] = _fold_bn(ra["cpool"], ra["bnpool"])
    # Split cproj: rows 0..1023 = four spatial branches; rows 1024..1279 = pooled
    # branch (spatially constant -> folded into a per-image additive term).
    wproj = ra["cproj"]                                    # (1,1,1280,256)
    aspp["cproj4"] = _fold_bn(wproj[:, :, :1024, :], ra["bnproj"])
    aspp["pool_proj_w"] = wproj[0, 0, 1024:, :].astype(jnp.float32)  # (256,256)
    P["aspp"] = aspp

    P["head_conv"] = _fold_bn(raw["head_conv"], raw["head_bn"])
    P["cls"] = _pack_conv(raw["cls_w"], jnp.ones((2,), jnp.float32), raw["cls_b"])
    return P


# ------------------------------ model forward ------------------------------

def _bottleneck_forward(x, p):
    identity = x
    out = conv_bn(x, p["conv1"], relu=True)
    out = conv_bn(out, p["conv2"], stride=p["stride"],
                  dilation=p["dilation"], padding=p["dilation"], relu=True)
    if "dconv" in p:
        identity = conv_bn(x, p["dconv"], stride=p["stride"], relu=False)
    # fused: bn3(conv3(out)) + identity -> ReLU
    return conv_bn(out, p["conv3"], relu=True, residual=identity)


def _aspp_forward(x, p):
    N, H, W, _ = x.shape
    branches = [conv_bn(x, p["c0"], relu=True)]
    for i, r in enumerate(p["rates"]):
        branches.append(conv_bn(x, p["c%d" % (i + 1)],
                                dilation=r, padding=r, relu=True))
    # ASPPPooling: AdaptiveAvgPool2d(1) -> 1x1 conv -> BN -> ReLU -> upsample.
    # Its contribution to the projection conv is spatially constant, so it is
    # applied as an f32 per-image additive term inside the projection-conv
    # epilogue (no (N,H,W,256) broadcast slab, no 1280-channel concat).
    gp = jnp.mean(x.astype(jnp.float32), axis=(1, 2), keepdims=True)
    gp = conv_bn(gp.astype(jnp.bfloat16), p["cpool"], relu=True,
                 out_dtype=jnp.float32)                               # (N,1,1,256)
    pc = pallas_matmul(gp.reshape(N, 256), p["pool_proj_w"],
                       operand_dtype=jnp.float32)                     # (N,256) f32
    Np = p["cproj4"]["w"].shape[1]
    add = jnp.pad(pc, ((0, 0), (0, Np - 256))) * p["cproj4"]["scale"]  # (N,Np) f32

    cat = jnp.concatenate(branches, axis=-1)                          # (N,H,W,1024)
    rpi = H * W
    if rpi % 8 == 0:
        y = conv_bn(cat, p["cproj4"], relu=True,
                    row_add=add, rows_per_image=rpi)
    else:
        # tiny-feature-map fallback (OS8 map narrower than 8 px)
        res = jnp.broadcast_to(add[:, None, None, :256], (N, H, W, 256))
        y = conv_bn(cat, p["cproj4"], relu=True, residual=res)
    # Dropout(0.5) is identity in eval mode
    return y


def handseg_forward(params, x_nchw):
    """HandSegModel.forward: deeplabv3_resnet50(num_classes=2)(x)['out'].
    Input NCHW float32, output NCHW logits (N, 2, H, W)."""
    x = jnp.transpose(x_nchw.astype(jnp.float32), (0, 2, 3, 1))  # -> NHWC
    N, H, W, _ = x.shape
    # ResNet-50 stem
    y = conv_bn(x, params["conv1"], stride=2, padding=3, relu=True)
    y = maxpool2d(y, 3, 2, 1)
    # layer1..layer4 (output stride 8 via dilation in layer3/4)
    for layer in params["layers"]:
        for blk in layer:
            y = _bottleneck_forward(y, blk)
    # DeepLabHead
    y = _aspp_forward(y, params["aspp"])
    y = conv_bn(y, params["head_conv"], padding=1, relu=True)
    # classifier: bf16 output, slice to the 2 logit channels before resize
    y = conv_bn(y, params["cls"], relu=False, out_dtype=jnp.bfloat16)
    # F.interpolate(..., size=input_shape, mode='bilinear', align_corners=False)
    y = bilinear_resize(y, H, W, out_dtype=jnp.float32)
    return jnp.transpose(y, (0, 3, 1, 2))  # -> NCHW


# ----------------------------------- main -----------------------------------

if __name__ == "__main__":
    raw = init_params(seed=42)
    params = prepare_params(raw)
    # deeplabv3_resnet50 expects 3-channel input; 64x64 keeps the test small
    # while making the OS8 feature maps 8x8 (exercises the per-image ASPP add
    # path and tile-aligned blocks).
    x = jax.random.normal(jax.random.PRNGKey(0), (2, 3, 64, 64), jnp.float32)
    out = handseg_forward(params, x)
    out = jax.block_until_ready(out)
    assert out.shape == (2, 2, 64, 64), out.shape
    assert bool(jnp.all(jnp.isfinite(out)))
    print("KERNEL_OK")
</pallas_src>

<mosaic_0001>
module attributes {stable_mosaic.version = 11 : i64} {
  func.func @_conv_mm_kernel(%arg0: i32, %arg1: i32, %arg2: i32, %arg3: memref<1024x256xbf16, #tpu.memory_space<vmem>>, %arg4: memref<256x128xbf16, #tpu.memory_space<vmem>>, %arg5: memref<1x128xf32, #tpu.memory_space<vmem>>, %arg6: memref<1x128xf32, #tpu.memory_space<vmem>>, %arg7: memref<1024x128xbf16, #tpu.memory_space<vmem>>, %arg8: memref<1024x128xf32, #tpu.memory_space<vmem>>) attributes {dimension_semantics = [#tpu.dimension_semantics<parallel>, #tpu.dimension_semantics<parallel>, #tpu.dimension_semantics<arbitrary>], iteration_bounds = array<i64: 2, 1, 1>, scalar_prefetch = 0 : i64, scratch_operands = 1 : i64, tpu.core_type = #tpu.core_type<tc>, window_params = [{transform_indices = @transform_0, window_bounds = array<i64: 1024, 256>}, {transform_indices = @transform_1, window_bounds = array<i64: 256, 128>}, {transform_indices = @transform_2, window_bounds = array<i64: 1, 128>}, {transform_indices = @transform_3, window_bounds = array<i64: 1, 128>}, {transform_indices = @transform_4, window_bounds = array<i64: 1024, 128>}]} {
    %c0_i32 = arith.constant 0 : i32
    %0 = arith.cmpi eq, %arg2, %c0_i32 : i32
    %1 = arith.extui %0 : i1 to i32
    %c0_i32_0 = arith.constant 0 : i32
    %2 = arith.cmpi ne, %1, %c0_i32_0 : i32
    scf.if %2 {
      %cst_10 = arith.constant 0.000000e+00 : f32
      %12 = vector.broadcast %cst_10 : f32 to vector<1024x128xf32>
      %c0_11 = arith.constant 0 : index
      %c0_12 = arith.constant 0 : index
      %13 = vector.load %arg8[%c0_11, %c0_12] : memref<1024x128xf32, #tpu.memory_space<vmem>>, vector<1024x128xf32>
      tpu.vector_store %arg8[%c0_11, %c0_12], %12 {strides = array<i32>} : memref<1024x128xf32, #tpu.memory_space<vmem>>, vector<1024x128xf32>,
    } else {
    }
    %c0 = arith.constant 0 : index
    %c0_1 = arith.constant 0 : index
    %3 = vector.load %arg8[%c0, %c0_1] : memref<1024x128xf32, #tpu.memory_space<vmem>>, vector<1024x128xf32>
    %c0_2 = arith.constant 0 : index
    %c0_3 = arith.constant 0 : index
    %4 = vector.load %arg3[%c0_2, %c0_3] : memref<1024x256xbf16, #tpu.memory_space<vmem>>, vector<1024x256xbf16>
    %c0_4 = arith.constant 0 : index
    %c0_5 = arith.constant 0 : index
    %5 = vector.load %arg4[%c0_4, %c0_5] : memref<256x128xbf16, #tpu.memory_space<vmem>>, vector<256x128xbf16>
    %cst = arith.constant dense<0.000000e+00> : vector<1024x128xf32>
    %6 = tpu.matmul %4, %5, %cst {dimension_numbers = #tpu.dot_dimension_numbers<[1], [0], [0], [1], [0, 0, 1, 1], [], []>} : vector<1024x256xbf16>, vector<256x128xbf16>, vector<1024x128xf32> -> vector<1024x128xf32>
    %7 = arith.addf %3, %6 : vector<1024x128xf32>
    %c0_6 = arith.constant 0 : index
    %c0_7 = arith.constant 0 : index
    %8 = vector.load %arg8[%c0_6, %c0_7] : memref<1024x128xf32, #tpu.memory_space<vmem>>, vector<1024x128xf32>
    tpu.vector_store %arg8[%c0_6, %c0_7], %7 {strides = array<i32>} : memref<1024x128xf32, #tpu.memory_space<vmem>>, vector<1024x128xf32>,
    %c0_i32_8 = arith.constant 0 : i32
    %9 = arith.cmpi eq, %arg2, %c0_i32_8 : i32
    %10 = arith.extui %9 : i1 to i32
    %c0_i32_9 = arith.constant 0 : i32
    %11 = arith.cmpi ne, %10, %c0_i32_9 : i32
    scf.if %11 {
      %c0_10 = arith.constant 0 : index
      %c0_11 = arith.constant 0 : index
      %12 = vector.load %arg8[%c0_10, %c0_11] : memref<1024x128xf32, #tpu.memory_space<vmem>>, vector<1024x128xf32>
      %c0_12 = arith.constant 0 : index
      %c0_13 = arith.constant 0 : index
      %13 = vector.load %arg5[%c0_12, %c0_13] : memref<1x128xf32, #tpu.memory_space<vmem>>, vector<1x128xf32>
      %14 = vector.broadcast %13 : vector<1x128xf32> to vector<1024x128xf32>
      %15 = arith.mulf %12, %14 : vector<1024x128xf32>
      %c0_14 = arith.constant 0 : index
      %c0_15 = arith.constant 0 : index
      %16 = vector.load %arg6[%c0_14, %c0_15] : memref<1x128xf32, #tpu.memory_space<vmem>>, vector<1x128xf32>
      %17 = vector.broadcast %16 : vector<1x128xf32> to vector<1024x128xf32>
      %18 = arith.addf %15, %17 : vector<1024x128xf32>
      %cst_16 = arith.constant 0.000000e+00 : f32
      %19 = vector.broadcast %cst_16 : f32 to vector<1024x128xf32>
      %20 = arith.maximumf %18, %19 : vector<1024x128xf32>
      %21 = arith.truncf %20 : vector<1024x128xf32> to vector<1024x128xbf16>
      %c0_17 = arith.constant 0 : index
      %c0_18 = arith.constant 0 : index
      %22 = vector.load %arg7[%c0_17, %c0_18] : memref<1024x128xbf16, #tpu.memory_space<vmem>>, vector<1024x128xbf16>
      tpu.vector_store %arg7[%c0_17, %c0_18], %21 {strides = array<i32>} : memref<1024x128xbf16, #tpu.memory_space<vmem>>, vector<1024x128xbf16>,
    } else {
    }
    return
  }
  func.func @transform_0(%arg0: i32, %arg1: i32, %arg2: i32) -> (i32, i32) {
    %c0_i32 = arith.constant 0 : i32
    return %arg0, %arg2 : i32, i32
  }
  func.func @transform_1(%arg0: i32, %arg1: i32, %arg2: i32) -> (i32, i32) {
    %c0_i32 = arith.constant 0 : i32
    return %arg2, %arg1 : i32, i32
  }
  func.func @transform_2(%arg0: i32, %arg1: i32, %arg2: i32) -> (i32, i32) {
    %c0_i32 = arith.constant 0 : i32
    %c0_i32_0 = arith.constant 0 : i32
    return %c0_i32, %arg1 : i32, i32
  }
  func.func @transform_3(%arg0: i32, %arg1: i32, %arg2: i32) -> (i32, i32) {
    %c0_i32 = arith.constant 0 : i32
    %c0_i32_0 = arith.constant 0 : i32
    return %c0_i32, %arg1 : i32, i32
  }
  func.func @transform_4(%arg0: i32, %arg1: i32, %arg2: i32) -> (i32, i32) {
    %c0_i32 = arith.constant 0 : i32
    return %arg0, %arg1 : i32, i32
  }
}

</mosaic_0001>

<bundles_post_ra>
// kernel: tpu_custom_call.1
= control target key start
LH: loop header
LB: loop body
LE: loop exit
PB: predicated region body
PF: predicated region fallthrough
CT: control target
= control target key end

     0   :  { %9 = vsyncpa [#allocation4], 0  ;;  %s5605_s0 = inlined_call_operand.hbm [shape: bf16[2048,256], index: 0, kind: input, shape index: {}]   ;;  %s5606_s1 = inlined_call_operand.hbm [shape: bf16[256,128], index: 1, kind: input, shape index: {}]   ;;  %s5607_s2 = inlined_call_operand.vmem [shape: f32[1,128], index: 2, kind: input, shape index: {}]   ;;  %s5608_s3 = inlined_call_operand.vmem [shape: f32[1,128], index: 3, kind: input, shape index: {}]   ;;  %s5609_s4 = inlined_call_operand.hbm [shape: bf16[2048,128], index: 4, kind: output, shape index: {}]  }
   0x1   :  { %11 = vsyncpa [#allocation4 + $0x1], 0 }
   0x2   :  { %12 = vsyncpa [#allocation7], 0 }
   0x3   :  { %13 = vsyncpa [#allocation5], 0 }
   0x4   :  { %15 = vsyncpa [#allocation5 + $0x1], 0  ;;  %s4880_s15 = smov 0   ;;  %s4882_s16 = smov 0  }
   0x5   :  { %s4884_s17 = smov 0   ;;  %s4886_s18 = smov 0  }
   0x6   :  { %s4888_s19 = smov 0   ;;  %s4890_s20 = smov 0  }
   0x7 LB: > { %s3569_s21 = sadd.s32 4294967295, %s4843_s20   ;;  %s3570_s22 = sadd.s32 4294967294, %s4843_s20   ;;  %s4843_s20 = sphi %s4890_s20, %s21_s20   ;;  %s4839_s19 = sphi %s4888_s19, %s5633_s19   ;;  %s4835_s18 = sphi %s4886_s18, %s5632_s18   ;;  %s4831_s17 = sphi %s4884_s17, %s5631_s17   ;;  %s4827_s16 = sphi %s4882_s16, %s5630_s16   ;;  %s4823_s15 = sphi %s4880_s15, %s5629_s15  }
   0x8   : > { %p62_p0 = scmp.ne.s32.totalorder %s4827_s16, %s4823_s15  ;;  %p4914_p1 = scmp.eq.s32.totalorder %s3569_s21, 0 }
   0x9   : > { %p4918_p2 = scmp.eq.s32.totalorder %s3569_s21, 1  ;;  %p174_p3 = scmp.eq.s32.totalorder %s3570_s22, 1 }
   0xa   : > { %s5614_s23 = scalar_select %p4914_p1, 1, 0 }
   0xb   : > { %s5615_s24 = scalar_select %p4918_p2, 1, 0 }
   0xc   : > { %p4924_p4 = por %p4914_p1, %p62_p0  ;;  %p3571_p5 = scmp.ge.s32.totalorder %s4843_s20, 1 }
   0xd   : > { %p4929_p6 = por %p174_p3, %p62_p0  ;;  %p181_p7 = scmp.lt.s32.totalorder %s4843_s20, 3 }
   0xe   : > { %s5616_s25 = scalar_select %p4924_p4, 1, 0 }
   0xf   : > { %s5617_s26 = scalar_select %p4929_p6, 1, 0 }
  0x10   : > { %p4934_p8 = pnand %p3571_p5, %p181_p7  ;;  %s4845_s28 = smov [#allocation6]  }
  0x11   : > { %s197_s29 = sshll.u32 %s4845_s28, 4  ;;  %s40_s5 = sadd.s32 1, %s4839_s19  ;;  %s198_s29 = int_to_ptr.vmem [resolvable:$true] %s197_s29 }
  0x12   : > { %s5618_s27 = scalar_select %p4934_p8, 1, 0 }
  0x13   : > { %p4417_p9 = pneg %p4934_p8  ;;  %s4699_s8 = scalar_lea.hbm %s5606_s1, 2048 }
  0x14   : > { %p4700_p12 = scmp.ne.s32.totalorder %s5606_s1, %s4699_s8  ;;  %p4706_p5 = scmp.lt.u32.totalorder %s4699_s8, %s5606_s1 }
  0x15   : > { %p4943_p11 = pnand %p4417_p9, %p4914_p1 }
  0x17   : > { %p4701_p13 = pneg %p4943_p11 }
  0x19   : > { %p4702_p0 = pnand %p4701_p13, %p4700_p12 }
  0x1b   : > { %p4703_p3 = pneg %p4702_p0 }
  0x1d   : > { %p4708_p7 = pnand %p4706_p5, %p4703_p3 }
  0x1f   : > { %4711 = shalt.err (!%p4708_p7)
}
  0x20   : > { %s4712_s13 = scalar_lea.vmem %s198_s29, 2048  ;;  %p4720_p1 = scmp.lt.s32.totalorder %s198_s29, %s198_s29 }
  0x21   : > { %p4713_p9 = scmp.ne.s32.totalorder %s198_s29, %s4712_s13  ;;  %p4721_p4 = scmp.lt.s32.totalorder %s4712_s13, %s4712_s13 }
  0x23   : > { %p4715_p10 = pnand %p4713_p9, %p4701_p13  ;;  %p4722_p8 = por %p4721_p4, %p4720_p1 }
  0x25   : > { %p4716_p6 = pneg %p4715_p10 }
  0x27   : > { %p4723_p2 = pnand %p4722_p8, %p4716_p6 }
  0x29   : > { %4726 = shalt.err (!%p4723_p2)
}
  0x2a   : > { %s4846_s14 = smov 64   ;;  %s4847_s21 = smov 4  }
  0x2b   : > { %4420 = dma.hbm_to_vmem [thread:$0]  (!%p4943_p11), %s5606_s1, 2048, %s198_s29, [#allocation7], %s4846_s14, %s4846_s14, %s4847_s21  }
  0x2c   : > { %p42_p1 = scmp.ge.s32.totalorder %s40_s5, 2  ;;  %s49_s6 = sadd.s32 1, %s4831_s17 }
  0x2d   : > { %p56_p2 = scmp.ne.s32.totalorder %s4831_s17, %s4827_s16  ;;  %p57_p4 = scmp.eq.s32.totalorder %s4843_s20, 0 }
  0x2e   : > { %s5635_s5 = smov (%p42_p1, %s40_s5), 0  ;;  %p5621_p8 = scmp.ne.s32.totalorder %s5615_s24, 0 }
  0x2f   : > { %p4970_p6 = por %p57_p4, %p56_p2  ;;  %s44_s30 = ssub.s32 %s4839_s19, %s5635_s5 }
  0x30   : > { %p4976_p10 = por %p5621_p8, %p56_p2  ;;  %p4430_p12 = scmp.lt.s32.totalorder %s4843_s20, 2 }
  0x31   : > { %p47_p11 = scmp.eq.s32.totalorder %s44_s30, 0  ;;  %s223_s29 = sand.u32 1, %s4831_s17  }
  0x32   : > { %s3576_s9 = sshll.u32 %s223_s29, 10  ;;  %s3864_s11 = sshll.u32 %s4839_s19, 14 }
  0x33   : > { %s4985_s10 = scalar_select %p47_p11, %s4831_s17, %s49_s6  }
  0x34   : > { %s4991_s14 = scalar_lea.hbm %s5605_s0, %s3864_s11  ;;  %s227_s24 = scalar_lea.vmem [#allocation3], %s3576_s9 }
  0x35   : > { %s237_s21 = sshll.u32 %s227_s24, 4  ;;  %p4997_p13 = pnand %p4430_p12, %p4970_p6  ;;  %s4993_s21 = int_to_ptr.vmem [resolvable:$true] %s237_s21 }
  0x36   : > { %s5001_s28 = scalar_lea.sflag [#allocation4], %s223_s29  ;;  %s4727_s6 = scalar_lea.hbm %s4991_s14, 16384 }
  0x37   : > { %p4728_p0 = scmp.ne.s32.totalorder %s4991_s14, %s4727_s6  ;;  %p4729_p3 = pneg %p4997_p13 }
  0x38   : > { %s4732_s7 = scalar_lea.hbm %s5605_s0, 32768  ;;  %p4733_p9 = scmp.lt.u32.totalorder %s4991_s14, %s5605_s0 }
  0x39   : > { %p4730_p5 = pnand %p4729_p3, %p4728_p0  ;;  %p4734_p1 = scmp.lt.u32.totalorder %s4732_s7, %s4727_s6 }
  0x3a   : > { %p4736_p4 = scmp.lt.u32.totalorder %s4727_s6, %s4991_s14 }
  0x3b   : > { %p4731_p7 = pneg %p4730_p5  ;;  %p4735_p2 = por %p4734_p1, %p4733_p9 }
  0x3d   : > { %p4737_p6 = por %p4736_p4, %p4735_p2 }
  0x3f   : > { %p4738_p8 = pnand %p4737_p6, %p4731_p7 }
  0x41   : > { %4741 = shalt.err (!%p4738_p8)
}
  0x42   : > { %s4742_s29 = scalar_lea.vmem %s4993_s21, 16384  ;;  %s4848_s13 = smov [#allocation3]  }
  0x43   : > { %p4743_p12 = scmp.ne.s32.totalorder %s4993_s21, %s4742_s29  ;;  %s4747_s24 = sshll.u32 %s4848_s13, 4  ;;  %s4748_s24 = int_to_ptr.vmem [resolvable:$false] %s4747_s24 }
  0x44   : > { %s4749_s30 = scalar_lea.vmem %s4748_s24, 32768  ;;  %p4750_p5 = scmp.lt.s32.totalorder %s4993_s21, %s4748_s24 }
  0x45   : > { %p4745_p11 = pnand %p4743_p12, %p4729_p3  ;;  %p4751_p9 = scmp.lt.s32.totalorder %s4749_s30, %s4742_s29 }
  0x47   : > { %p4746_p0 = pneg %p4745_p11  ;;  %p4752_p1 = por %p4751_p9, %p4750_p5 }
  0x49   : > { %p4753_p2 = pnand %p4752_p1, %p4746_p0 }
  0x4b   : > { %4756 = shalt.err (!%p4753_p2)
}
  0x4c   : > { %s4849_s6 = smov 128   ;;  %s4850_s9 = smov 8  }
  0x4d   : > { %4424 = dma.hbm_to_vmem [thread:$0]  (!%p4997_p13), %s4991_s14, 16384, %s4993_s21, %s5001_s28, %s4849_s6, %s4849_s6, %s4850_s9  }
  0x4e   : > { %p5624_p3 = scmp.ne.s32.totalorder %s5618_s27, 0 }
  0x4f   : > { %s5032_s7 = sand.u32 (!%p5624_p3), 1, %s4827_s16   ;;  %p5625_p7 = scmp.ne.s32.totalorder (!%p5624_p3), %s5616_s25, 0 }
  0x50   : > { %249 = sbr.rel (%p5624_p3) target bundleno = 642 (0x282), region = 36  ;;  %s3581_s11 = sshll.u32 (!%p5624_p3), %s5032_s7, 10 }
  0x51   : > { %s252_s12 = scalar_lea.sflag (!%p5624_p3), [#allocation4], %s5032_s7  ;;  %s5036_s29 = scalar_lea.vmem (!%p5624_p3), [#allocation3], %s3581_s11 }
  0x57   : > { %4810 = dma.done.wait (%p5625_p7), %s252_s12, 16384  }
  0x58   : > { %4812 = vsyncadd (%p5625_p7), %s252_s12, 4294950912  ;;  %p5626_p13 = scmp.ne.s32.totalorder %s5614_s23, 0 }
  0x5a   : > { %4814 = dma.done.wait (%p5626_p13), [#allocation7], 2048  }
  0x5b   : > { %4816 = vsyncadd (%p5626_p13), [#allocation7], 4294965248  ;;  %v4851_v0 = vmov 0   ;;  %v4489_v1 = vld [vmem:[#allocation6] sm:$0xff]   ;;  %v4490_v2 = vld [vmem:[#allocation6 + $0x8] sm:$0xff]   ;;  %s3583_s21 = sshll.u32 %s5032_s7, 9 }
  0x5c   : > { %1457 = vmatprep.subr.bf16.mxu0 %v4851_v0  ;;  %4377 = vmatprep.subr.bf16.mxu1 %v4851_v0  ;;  %v4491_v3 = vld [vmem:[#allocation6 + $0x10] sm:$0xff]   ;;  %v4492_v4 = vld [vmem:[#allocation6 + $0x18] sm:$0xff]   ;;  %v4493_v5 = vld [vmem:[#allocation6 + $0x20] sm:$0xff]   ;;  %s5217_s22 = scalar_lea.vmem [#allocation8], %s3583_s21  ;;  %s3993_s6 = sshll.u32 %s4835_s18, 13 }
  0x5d   : > { %1458 = vmatpush1.bf16.msra.mxu0 %v4489_v1  ;;  %4393 = vmatpush1.bf16.msra.mxu1 %v4489_v1  ;;  %v4507_v6 = vld [vmem:[%s5036_s29 + $0x4] ss:$8 sps:$4 sm:$0xff]   ;;  %v4495_v9 = vld [vmem:[#allocation6 + $0x30] sm:$0xff]   ;;  %v4496_v10 = vld [vmem:[#allocation6 + $0x38] sm:$0xff]   ;;  %s3442_s9 = sshll.u32 %s5217_s22, 4  ;;  %s3428_s18 = scalar_lea.sflag [#allocation5], %s5032_s7  ;;  %s5554_s9 = int_to_ptr.vmem [resolvable:$true] %s3442_s9 }
  0x5e   : > { %1459 = vmatprep.subr.bf16.mxu0 %v4851_v0  ;;  %4378 = vmatprep.subr.bf16.mxu1 %v4851_v0  ;;  %v4494_v7 = vld [vmem:[#allocation6 + $0x28] sm:$0xff]   ;;  %v4497_v11 = vld [vmem:[#allocation6 + $0x40] sm:$0xff]   ;;  %v4499_v13 = vld [vmem:[#allocation6 + $0x50] sm:$0xff]   ;;  %s4757_s23 = scalar_lea.vmem %s5554_s9, 8192  ;;  %s4852_s25 = smov [#allocation8]  }
  0x5f   : > { %v4510_v8 = vld [vmem:[%s5036_s29 + $0x204] ss:$8 sps:$4 sm:$0xff]   ;;  %1489 = vmatprep.mubr.bf16.mxu0 %v4507_v6  ;;  %v4500_v14 = vld [vmem:[#allocation6 + $0x58] sm:$0xff]   ;;  %v4503_v17 = vld [vmem:[#allocation6 + $0x70] sm:$0xff]   ;;  %p4758_p4 = scmp.ne.s32.totalorder %s5554_s9, %s4757_s23  ;;  %s4761_s27 = sshll.u32 %s4852_s25, 4  ;;  %s4762_s27 = int_to_ptr.vmem [resolvable:$false] %s4761_s27 }
  0x60   : > { %1745 = vmatprep.mubr.bf16.mxu1 %v4510_v8  ;;  %v4498_v12 = vld [vmem:[#allocation6 + $0x48] sm:$0xff]   ;;  %v4501_v15 = vld [vmem:[#allocation6 + $0x60] sm:$0xff]   ;;  %v4504_v18 = vld [vmem:[#allocation6 + $0x78] sm:$0xff]   ;;  %s4763_s14 = scalar_lea.vmem %s4762_s27, 16384  ;;  %p4764_p12 = scmp.lt.s32.totalorder %s5554_s9, %s4762_s27 }
  0x61   : > { %1460 = vmatpush1.bf16.msra.mxu0 %v4490_v2  ;;  %4394 = vmatpush1.bf16.msra.mxu1 %v4490_v2  ;;  %v4502_v16 = vld [vmem:[#allocation6 + $0x68] sm:$0xff]   ;;  %v4511_v21 = vld [vmem:[%s5036_s29 + $0x14] ss:$8 sps:$4 sm:$0xff]   ;;  %v4515_v23 = vld [vmem:[%s5036_s29 + $0x10] ss:$8 sps:$4 sm:$0xff]   ;;  %p4759_p6 = pnand %p4758_p4, %p4976_p10  ;;  %p4765_p11 = scmp.lt.s32.totalorder %s4763_s14, %s4757_s23 }
  0x62   : > { %1461 = vmatprep.subr.bf16.mxu0 %v4851_v0  ;;  %4379 = vmatprep.subr.bf16.mxu1 %v4851_v0  ;;  %v4505_v19 = vld [vmem:[%s5036_s29] ss:$8 sps:$4 sm:$0xff]   ;;  %v4513_v22 = vld [vmem:[%s5036_s29 + $0x214] ss:$8 sps:$4 sm:$0xff]   ;;  %v4516_v24 = vld [vmem:[%s5036_s29 + $0x210] ss:$8 sps:$4 sm:$0xff]  }
  0x63   : > { %v4508_v20 = vld [vmem:[%s5036_s29 + $0x200] ss:$8 sps:$4 sm:$0xff]   ;;  %v4517_v25 = vld [vmem:[%s5036_s29 + $0x24] ss:$8 sps:$4 sm:$0xff]   ;;  %v4523_v29 = vld [vmem:[%s5036_s29 + $0x34] ss:$8 sps:$4 sm:$0xff]   ;;  %p4760_p8 = pneg %p4759_p6  ;;  %p4766_p0 = por %p4765_p11, %p4764_p12 }
  0x64   : > { %v4519_v26 = vld [vmem:[%s5036_s29 + $0x224] ss:$8 sps:$4 sm:$0xff]   ;;  %v4521_v27 = vld [vmem:[%s5036_s29 + $0x20] ss:$8 sps:$4 sm:$0xff]   ;;  %v4525_v30 = vld [vmem:[%s5036_s29 + $0x234] ss:$8 sps:$4 sm:$0xff]  }
  0x65   : > { %1462 = vmatpush1.bf16.msra.mxu0 %v4491_v3  ;;  %4395 = vmatpush1.bf16.msra.mxu1 %v4491_v3  ;;  %v4522_v28 = vld [vmem:[%s5036_s29 + $0x220] ss:$8 sps:$4 sm:$0xff]   ;;  %v4527_v31 = vld [vmem:[%s5036_s29 + $0x30] ss:$8 sps:$4 sm:$0xff]   ;;  %v4529_v33 = vld [vmem:[%s5036_s29 + $0x44] ss:$8 sps:$4 sm:$0xff]   ;;  %p4767_p5 = pnand %p4766_p0, %p4760_p8 }
  0x66   : > { %1463 = vmatprep.subr.bf16.mxu0 %v4851_v0  ;;  %4380 = vmatprep.subr.bf16.mxu1 %v4851_v0  ;;  %v4528_v32 = vld [vmem:[%s5036_s29 + $0x230] ss:$8 sps:$4 sm:$0xff]   ;;  %v4531_v34 = vld [vmem:[%s5036_s29 + $0x244] ss:$8 sps:$4 sm:$0xff]   ;;  %v4533_v35 = vld [vmem:[%s5036_s29 + $0x40] ss:$8 sps:$4 sm:$0xff]  }
  0x67   : > { %v4534_v36 = vld [vmem:[%s5036_s29 + $0x240] ss:$8 sps:$4 sm:$0xff]   ;;  %v4535_v37 = vld [vmem:[%s5036_s29 + $0x54] ss:$8 sps:$4 sm:$0xff]   ;;  %v4539_v39 = vld [vmem:[%s5036_s29 + $0x50] ss:$8 sps:$4 sm:$0xff]  }
  0x68   : > { %v4537_v38 = vld [vmem:[%s5036_s29 + $0x254] ss:$8 sps:$4 sm:$0xff]   ;;  %v4540_v40 = vld [vmem:[%s5036_s29 + $0x250] ss:$8 sps:$4 sm:$0xff]   ;;  %v4541_v41 = vld [vmem:[%s5036_s29 + $0x64] ss:$8 sps:$4 sm:$0xff]  }
  0x69   : > { %1464 = vmatpush1.bf16.msra.mxu0 %v4492_v4  ;;  %4396 = vmatpush1.bf16.msra.mxu1 %v4492_v4  ;;  %v4543_v42 = vld [vmem:[%s5036_s29 + $0x264] ss:$8 sps:$4 sm:$0xff]   ;;  %v4545_v43 = vld [vmem:[%s5036_s29 + $0x60] ss:$8 sps:$4 sm:$0xff]   ;;  %v4547_v45 = vld [vmem:[%s5036_s29 + $0x74] ss:$8 sps:$4 sm:$0xff]  }
  0x6a   : > { %1465 = vmatprep.subr.bf16.mxu0 %v4851_v0  ;;  %4381 = vmatprep.subr.bf16.mxu1 %v4851_v0  ;;  %v4546_v44 = vld [vmem:[%s5036_s29 + $0x260] ss:$8 sps:$4 sm:$0xff]   ;;  %v4549_v46 = vld [vmem:[%s5036_s29 + $0x274] ss:$8 sps:$4 sm:$0xff]   ;;  %v4551_v47 = vld [vmem:[%s5036_s29 + $0x70] ss:$8 sps:$4 sm:$0xff]  }
  0x6b   : > { %v4552_v48 = vld [vmem:[%s5036_s29 + $0x270] ss:$8 sps:$4 sm:$0xff]   ;;  %v4553_v49 = vld [vmem:[%s5036_s29 + $0x84] ss:$8 sps:$4 sm:$0xff]   ;;  %v4557_v51 = vld [vmem:[%s5036_s29 + $0x80] ss:$8 sps:$4 sm:$0xff]  }
  0x6c   : > { %v4555_v50 = vld [vmem:[%s5036_s29 + $0x284] ss:$8 sps:$4 sm:$0xff]   ;;  %v4558_v52 = vld [vmem:[%s5036_s29 + $0x280] ss:$8 sps:$4 sm:$0xff]   ;;  %v4559_v53 = vld [vmem:[%s5036_s29 + $0x94] ss:$8 sps:$4 sm:$0xff]  }
  0x6d   : > { %1466 = vmatpush1.bf16.msra.mxu0 %v4493_v5  ;;  %4397 = vmatpush1.bf16.msra.mxu1 %v4493_v5  ;;  %v4561_v54 = vld [vmem:[%s5036_s29 + $0x294] ss:$8 sps:$4 sm:$0xff]   ;;  %v4563_v55 = vld [vmem:[%s5036_s29 + $0x90] ss:$8 sps:$4 sm:$0xff]   ;;  %v4565_v57 = vld [vmem:[%s5036_s29 + $0xa4] ss:$8 sps:$4 sm:$0xff]  }
  0x6e   : > { %1467 = vmatprep.subr.bf16.mxu0 %v4851_v0  ;;  %4382 = vmatprep.subr.bf16.mxu1 %v4851_v0  ;;  %v4564_v56 = vld [vmem:[%s5036_s29 + $0x290] ss:$8 sps:$4 sm:$0xff]   ;;  %v4567_v58 = vld [vmem:[%s5036_s29 + $0x2a4] ss:$8 sps:$4 sm:$0xff]   ;;  %v4569_v59 = vld [vmem:[%s5036_s29 + $0xa0] ss:$8 sps:$4 sm:$0xff]  }
  0x6f   : > { %v4570_v60 = vld [vmem:[%s5036_s29 + $0x2a0] ss:$8 sps:$4 sm:$0xff]   ;;  %v4571_v61 = vld [vmem:[%s5036_s29 + $0xb4] ss:$8 sps:$4 sm:$0xff]   ;;  %v4575_v63 = vld [vmem:[%s5036_s29 + $0xb0] ss:$8 sps:$4 sm:$0xff]  }
  0x70   : > { %v4573_v62 = vld [vmem:[%s5036_s29 + $0x2b4] ss:$8 sps:$4 sm:$0xff]   ;;  %v4577_v1 = vld [vmem:[%s5036_s29 + $0xc4] ss:$8 sps:$4 sm:$0xff]   ;;  %v4581_v3 = vld [vmem:[%s5036_s29 + $0xc0] ss:$8 sps:$4 sm:$0xff]  }
  0x71   : > { %1468 = vmatpush1.bf16.msra.mxu0 %v4494_v7  ;;  %4398 = vmatpush1.bf16.msra.mxu1 %v4494_v7  ;;  %v4579_v2 = vld [vmem:[%s5036_s29 + $0x2c4] ss:$8 sps:$4 sm:$0xff]   ;;  %v4582_v4 = vld [vmem:[%s5036_s29 + $0x2c0] ss:$8 sps:$4 sm:$0xff]   ;;  %v4583_v5 = vld [vmem:[%s5036_s29 + $0xd4] ss:$8 sps:$4 sm:$0xff]  }
  0x72   : > { %1469 = vmatprep.subr.bf16.mxu0 %v4851_v0  ;;  %4383 = vmatprep.subr.bf16.mxu1 %v4851_v0  ;;  %v4585_v6 = vld [vmem:[%s5036_s29 + $0x2d4] ss:$8 sps:$4 sm:$0xff]   ;;  %v4587_v7 = vld [vmem:[%s5036_s29 + $0xd0] ss:$8 sps:$4 sm:$0xff]  }
  0x73   : > { %v4588_v8 = vld [vmem:[%s5036_s29 + $0x2d0] ss:$8 sps:$4 sm:$0xff]  }
  0x75   : > { %1470 = vmatpush1.bf16.msra.mxu0 %v4495_v9  ;;  %4399 = vmatpush1.bf16.msra.mxu1 %v4495_v9  ;;  %v4589_v9 = vld [vmem:[%s5036_s29 + $0xe4] ss:$8 sps:$4 sm:$0xff]  }
  0x76   : > { %1471 = vmatprep.subr.bf16.mxu0 %v4851_v0  ;;  %4384 = vmatprep.subr.bf16.mxu1 %v4851_v0 }
  0x79   : > { %1472 = vmatpush1.bf16.msra.mxu0 %v4496_v10  ;;  %4400 = vmatpush1.bf16.msra.mxu1 %v4496_v10  ;;  %v4591_v10 = vld [vmem:[%s5036_s29 + $0x2e4] ss:$8 sps:$4 sm:$0xff]  }
  0x7a   : > { %1473 = vmatprep.subr.bf16.mxu0 %v4851_v0  ;;  %4385 = vmatprep.subr.bf16.mxu1 %v4851_v0 }
  0x7d   : > { %1474 = vmatpush1.bf16.msra.mxu0 %v4497_v11  ;;  %4401 = vmatpush1.bf16.msra.mxu1 %v4497_v11  ;;  %v4593_v11 = vld [vmem:[%s5036_s29 + $0xe0] ss:$8 sps:$4 sm:$0xff]  }
  0x7e   : > { %1475 = vmatprep.subr.bf16.mxu0 %v4851_v0  ;;  %4386 = vmatprep.subr.bf16.mxu1 %v4851_v0 }
  0x81   : > { %1476 = vmatpush1.bf16.msra.mxu0 %v4498_v12  ;;  %4402 = vmatpush1.bf16.msra.mxu1 %v4498_v12  ;;  %v4594_v12 = vld [vmem:[%s5036_s29 + $0x2e0] ss:$8 sps:$4 sm:$0xff]  }
  0x82   : > { %1477 = vmatprep.subr.bf16.mxu0 %v4851_v0  ;;  %4387 = vmatprep.subr.bf16.mxu1 %v4851_v0 }
  0x85   : > { %1478 = vmatpush1.bf16.msra.mxu0 %v4499_v13  ;;  %4403 = vmatpush1.bf16.msra.mxu1 %v4499_v13  ;;  %v4595_v13 = vld [vmem:[%s5036_s29 + $0xf4] ss:$8 sps:$4 sm:$0xff]  }
  0x86   : > { %1479 = vmatprep.subr.bf16.mxu0 %v4851_v0  ;;  %4388 = vmatprep.subr.bf16.mxu1 %v4851_v0 }
  0x89   : > { %1480 = vmatpush1.bf16.msra.mxu0 %v4500_v14  ;;  %4404 = vmatpush1.bf16.msra.mxu1 %v4500_v14  ;;  %v4597_v14 = vld [vmem:[%s5036_s29 + $0x2f4] ss:$8 sps:$4 sm:$0xff]  }
  0x8a   : > { %1481 = vmatprep.subr.bf16.mxu0 %v4851_v0  ;;  %4389 = vmatprep.subr.bf16.mxu1 %v4851_v0 }
  0x8d   : > { %1482 = vmatpush1.bf16.msra.mxu0 %v4501_v15  ;;  %4405 = vmatpush1.bf16.msra.mxu1 %v4501_v15  ;;  %v4599_v15 = vld [vmem:[%s5036_s29 + $0xf0] ss:$8 sps:$4 sm:$0xff]  }
  0x8e   : > { %1483 = vmatprep.subr.bf16.mxu0 %v4851_v0  ;;  %4390 = vmatprep.subr.bf16.mxu1 %v4851_v0 }
  0x91   : > { %1484 = vmatpush1.bf16.msra.mxu0 %v4502_v16  ;;  %4406 = vmatpush1.bf16.msra.mxu1 %v4502_v16  ;;  %v4600_v16 = vld [vmem:[%s5036_s29 + $0x2f0] ss:$8 sps:$4 sm:$0xff]  }
  0x92   : > { %1485 = vmatprep.subr.bf16.mxu0 %v4851_v0  ;;  %4391 = vmatprep.subr.bf16.mxu1 %v4851_v0 }
  0x95   : > { %1486 = vmatpush1.bf16.msra.mxu0 %v4503_v17  ;;  %4407 = vmatpush1.bf16.msra.mxu1 %v4503_v17  ;;  %v4601_v17 = vld [vmem:[%s5036_s29 + $0x104] ss:$8 sps:$4 sm:$0xff]  }
  0x96   : > { %1487 = vmatprep.subr.bf16.mxu0 %v4851_v0  ;;  %4392 = vmatprep.subr.bf16.mxu1 %v4851_v0  ;;  %v4576_v0 = vld [vmem:[%s5036_s29 + $0x2b0] ss:$8 sps:$4 sm:$0xff]  }
  0x99   : > { %1488 = vmatpush1.bf16.msra.mxu0 %v4504_v18  ;;  %4408 = vmatpush1.bf16.msra.mxu1 %v4504_v18  ;;  %v4603_v18 = vld [vmem:[%s5036_s29 + $0x304] ss:$8 sps:$4 sm:$0xff]  }
  0x9c   : > { %1490 = vmatmul.mubr.bf16.vlgmr.msra.gmra.mrb[0].mxu0 %v4505_v19  ;;  %1746 = vmatmul.mubr.bf16.vlgmr.msra.gmra.mrb[0].mxu1 %v4508_v20  ;;  %v4605_v19 = vld [vmem:[%s5036_s29 + $0x100] ss:$8 sps:$4 sm:$0xff]  }
  0x9d   : > { %1497 = vmatprep.mubr.bf16.mxu0 %v4511_v21  ;;  %1753 = vmatprep.mubr.bf16.mxu1 %v4513_v22  ;;  %v4606_v20 = vld [vmem:[%s5036_s29 + $0x300] ss:$8 sps:$4 sm:$0xff]   ;;  %v4607_v21 = vld [vmem:[%s5036_s29 + $0x114] ss:$8 sps:$4 sm:$0xff]  }
  0x9e   : > { %v4609_v22 = vld [vmem:[%s5036_s29 + $0x314] ss:$8 sps:$4 sm:$0xff]  }
  0xa4   : > { %1498 = vmatmul.mubr.bf16.gmra.mrb[4].mxu0 %v4515_v23  ;;  %1754 = vmatmul.mubr.bf16.gmra.mrb[4].mxu1 %v4516_v24  ;;  %v4611_v23 = vld [vmem:[%s5036_s29 + $0x110] ss:$8 sps:$4 sm:$0xff]  }
  0xa5   : > { %1505 = vmatprep.mubr.bf16.mxu0 %v4517_v25  ;;  %1761 = vmatprep.mubr.bf16.mxu1 %v4519_v26  ;;  %v4612_v24 = vld [vmem:[%s5036_s29 + $0x310] ss:$8 sps:$4 sm:$0xff]   ;;  %v4613_v25 = vld [vmem:[%s5036_s29 + $0x124] ss:$8 sps:$4 sm:$0xff]  }
  0xa6   : > { %v4615_v26 = vld [vmem:[%s5036_s29 + $0x324] ss:$8 sps:$4 sm:$0xff]  }
  0xac   : > { %1506 = vmatmul.mubr.bf16.gmra.mrb[8].mxu0 %v4521_v27  ;;  %1762 = vmatmul.mubr.bf16.gmra.mrb[8].mxu1 %v4522_v28  ;;  %v4617_v27 = vld [vmem:[%s5036_s29 + $0x120] ss:$8 sps:$4 sm:$0xff]  }
  0xad   : > { %1513 = vmatprep.mubr.bf16.mxu0 %v4523_v29  ;;  %1769 = vmatprep.mubr.bf16.mxu1 %v4525_v30  ;;  %v4618_v28 = vld [vmem:[%s5036_s29 + $0x320] ss:$8 sps:$4 sm:$0xff]   ;;  %v4619_v29 = vld [vmem:[%s5036_s29 + $0x134] ss:$8 sps:$4 sm:$0xff]  }
  0xae   : > { %v4621_v30 = vld [vmem:[%s5036_s29 + $0x334] ss:$8 sps:$4 sm:$0xff]  }
  0xb4   : > { %1514 = vmatmul.mubr.bf16.gmra.mrb[12].mxu0 %v4527_v31  ;;  %1770 = vmatmul.mubr.bf16.gmra.mrb[12].mxu1 %v4528_v32  ;;  %v4623_v31 = vld [vmem:[%s5036_s29 + $0x130] ss:$8 sps:$4 sm:$0xff]  }
  0xb5   : > { %1521 = vmatprep.mubr.bf16.mxu0 %v4529_v33  ;;  %1777 = vmatprep.mubr.bf16.mxu1 %v4531_v34  ;;  %v4624_v32 = vld [vmem:[%s5036_s29 + $0x330] ss:$8 sps:$4 sm:$0xff]   ;;  %v4625_v33 = vld [vmem:[%s5036_s29 + $0x144] ss:$8 sps:$4 sm:$0xff]  }
  0xb6   : > { %v4627_v34 = vld [vmem:[%s5036_s29 + $0x344] ss:$8 sps:$4 sm:$0xff]  }
  0xbc   : > { %1522 = vmatmul.mubr.bf16.gmra.mrb[16].mxu0 %v4533_v35  ;;  %1778 = vmatmul.mubr.bf16.gmra.mrb[16].mxu1 %v4534_v36  ;;  %v4629_v35 = vld [vmem:[%s5036_s29 + $0x140] ss:$8 sps:$4 sm:$0xff]  }
  0xbd   : > { %1529 = vmatprep.mubr.bf16.mxu0 %v4535_v37  ;;  %1785 = vmatprep.mubr.bf16.mxu1 %v4537_v38  ;;  %v4630_v36 = vld [vmem:[%s5036_s29 + $0x340] ss:$8 sps:$4 sm:$0xff]   ;;  %v4631_v37 = vld [vmem:[%s5036_s29 + $0x154] ss:$8 sps:$4 sm:$0xff]  }
  0xbe   : > { %v4633_v38 = vld [vmem:[%s5036_s29 + $0x354] ss:$8 sps:$4 sm:$0xff]  }
  0xc4   : > { %1530 = vmatmul.mubr.bf16.gmra.mrb[20].mxu0 %v4539_v39  ;;  %1786 = vmatmul.mubr.bf16.gmra.mrb[20].mxu1 %v4540_v40  ;;  %v4635_v39 = vld [vmem:[%s5036_s29 + $0x150] ss:$8 sps:$4 sm:$0xff]  }
  0xc5   : > { %1537 = vmatprep.mubr.bf16.mxu0 %v4541_v41  ;;  %1793 = vmatprep.mubr.bf16.mxu1 %v4543_v42  ;;  %v4636_v40 = vld [vmem:[%s5036_s29 + $0x350] ss:$8 sps:$4 sm:$0xff]   ;;  %v4637_v41 = vld [vmem:[%s5036_s29 + $0x164] ss:$8 sps:$4 sm:$0xff]  }
  0xc6   : > { %v4639_v42 = vld [vmem:[%s5036_s29 + $0x364] ss:$8 sps:$4 sm:$0xff]  }
  0xcc   : > { %1538 = vmatmul.mubr.bf16.gmra.mrb[24].mxu0 %v4545_v43  ;;  %1794 = vmatmul.mubr.bf16.gmra.mrb[24].mxu1 %v4546_v44  ;;  %v4641_v43 = vld [vmem:[%s5036_s29 + $0x160] ss:$8 sps:$4 sm:$0xff]  }
  0xcd   : > { %1545 = vmatprep.mubr.bf16.mxu0 %v4547_v45  ;;  %1801 = vmatprep.mubr.bf16.mxu1 %v4549_v46  ;;  %v4642_v44 = vld [vmem:[%s5036_s29 + $0x360] ss:$8 sps:$4 sm:$0xff]   ;;  %v4643_v45 = vld [vmem:[%s5036_s29 + $0x174] ss:$8 sps:$4 sm:$0xff]  }
  0xce   : > { %v4645_v46 = vld [vmem:[%s5036_s29 + $0x374] ss:$8 sps:$4 sm:$0xff]  }
  0xd4   : > { %1546 = vmatmul.mubr.bf16.gmra.mrb[28].mxu0 %v4551_v47  ;;  %1802 = vmatmul.mubr.bf16.gmra.mrb[28].mxu1 %v4552_v48  ;;  %v4647_v47 = vld [vmem:[%s5036_s29 + $0x170] ss:$8 sps:$4 sm:$0xff]  }
  0xd5   : > { %1553 = vmatprep.mubr.bf16.mxu0 %v4553_v49  ;;  %1809 = vmatprep.mubr.bf16.mxu1 %v4555_v50  ;;  %v4648_v48 = vld [vmem:[%s5036_s29 + $0x370] ss:$8 sps:$4 sm:$0xff]   ;;  %v4649_v49 = vld [vmem:[%s5036_s29 + $0x184] ss:$8 sps:$4 sm:$0xff]  }
  0xd6   : > { %v4651_v50 = vld [vmem:[%s5036_s29 + $0x384] ss:$8 sps:$4 sm:$0xff]  }
  0xdc   : > { %1554 = vmatmul.mubr.bf16.gmra.mrb[32].mxu0 %v4557_v51  ;;  %1810 = vmatmul.mubr.bf16.gmra.mrb[32].mxu1 %v4558_v52  ;;  %v4653_v51 = vld [vmem:[%s5036_s29 + $0x180] ss:$8 sps:$4 sm:$0xff]  }
  0xdd   : > { %1561 = vmatprep.mubr.bf16.mxu0 %v4559_v53  ;;  %1817 = vmatprep.mubr.bf16.mxu1 %v4561_v54  ;;  %v4654_v52 = vld [vmem:[%s5036_s29 + $0x380] ss:$8 sps:$4 sm:$0xff]   ;;  %v4655_v53 = vld [vmem:[%s5036_s29 + $0x194] ss:$8 sps:$4 sm:$0xff]  }
  0xde   : > { %v4657_v54 = vld [vmem:[%s5036_s29 + $0x394] ss:$8 sps:$4 sm:$0xff]  }
  0xe4   : > { %1562 = vmatmul.mubr.bf16.gmra.mrb[36].mxu0 %v4563_v55  ;;  %1818 = vmatmul.mubr.bf16.gmra.mrb[36].mxu1 %v4564_v56  ;;  %v4659_v55 = vld [vmem:[%s5036_s29 + $0x190] ss:$8 sps:$4 sm:$0xff]  }
  0xe5   : > { %1569 = vmatprep.mubr.bf16.mxu0 %v4565_v57  ;;  %1825 = vmatprep.mubr.bf16.mxu1 %v4567_v58  ;;  %v4660_v56 = vld [vmem:[%s5036_s29 + $0x390] ss:$8 sps:$4 sm:$0xff]   ;;  %v4661_v57 = vld [vmem:[%s5036_s29 + $0x1a4] ss:$8 sps:$4 sm:$0xff]  }
  0xe6   : > { %v4663_v58 = vld [vmem:[%s5036_s29 + $0x3a4] ss:$8 sps:$4 sm:$0xff]  }
  0xec   : > { %1570 = vmatmul.mubr.bf16.gmra.mrb[40].mxu0 %v4569_v59  ;;  %1826 = vmatmul.mubr.bf16.gmra.mrb[40].mxu1 %v4570_v60  ;;  %v4665_v59 = vld [vmem:[%s5036_s29 + $0x1a0] ss:$8 sps:$4 sm:$0xff]  }
  0xed   : > { %1577 = vmatprep.mubr.bf16.mxu0 %v4571_v61  ;;  %1833 = vmatprep.mubr.bf16.mxu1 %v4573_v62  ;;  %v4666_v60 = vld [vmem:[%s5036_s29 + $0x3a0] ss:$8 sps:$4 sm:$0xff]   ;;  %v4667_v61 = vld [vmem:[%s5036_s29 + $0x1b4] ss:$8 sps:$4 sm:$0xff]  }
  0xee   : > { %v4669_v62 = vld [vmem:[%s5036_s29 + $0x3b4] ss:$8 sps:$4 sm:$0xff]  }
  0xf4   : > { %1578 = vmatmul.mubr.bf16.gmra.mrb[44].mxu0 %v4575_v63  ;;  %1834 = vmatmul.mubr.bf16.gmra.mrb[44].mxu1 %v4576_v0  ;;  %v5191_v63 = vld [vmem:[%s5607_s2] ss:$0 sm:$0xff] }
  0xf5   : > { %1585 = vmatprep.mubr.bf16.mxu0 %v4577_v1  ;;  %1841 = vmatprep.mubr.bf16.mxu1 %v4579_v2  ;;  %v5196_v1 = vld [vmem:[%s5608_s3] ss:$0 sm:$0xff] }
  0xfc   : > { %1586 = vmatmul.mubr.bf16.gmra.mrb[48].mxu0 %v4581_v3  ;;  %1842 = vmatmul.mubr.bf16.gmra.mrb[48].mxu1 %v4582_v4 }
  0xfd   : > { %1593 = vmatprep.mubr.bf16.mxu0 %v4583_v5  ;;  %1849 = vmatprep.mubr.bf16.mxu1 %v4585_v6 }
 0x104   : > { %1594 = vmatmul.mubr.bf16.gmra.mrb[52].mxu0 %v4587_v7  ;;  %1850 = vmatmul.mubr.bf16.gmra.mrb[52].mxu1 %v4588_v8  ;;  %v4671_v7 = vld [vmem:[%s5036_s29 + $0x1b0] ss:$8 sps:$4 sm:$0xff]  }
 0x105   : > { %1601 = vmatprep.mubr.bf16.mxu0 %v4589_v9  ;;  %1857 = vmatprep.mubr.bf16.mxu1 %v4591_v10  ;;  %v4672_v8 = vld [vmem:[%s5036_s29 + $0x3b0] ss:$8 sps:$4 sm:$0xff]  }
 0x10c   : > { %1602 = vmatmul.mubr.bf16.gmra.mrb[56].mxu0 %v4593_v11  ;;  %1858 = vmatmul.mubr.bf16.gmra.mrb[56].mxu1 %v4594_v12  ;;  %v4673_v11 = vld [vmem:[%s5036_s29 + $0x1c4] ss:$8 sps:$4 sm:$0xff]  }
 0x10d   : > { %1609 = vmatprep.mubr.bf16.mxu0 %v4595_v13  ;;  %1865 = vmatprep.mubr.bf16.mxu1 %v4597_v14  ;;  %v4675_v12 = vld [vmem:[%s5036_s29 + $0x3c4] ss:$8 sps:$4 sm:$0xff]  }
 0x114   : > { %1610 = vmatmul.mubr.bf16.gmra.mrb[60].mxu0 %v4599_v15  ;;  %1866 = vmatmul.mubr.bf16.gmra.mrb[60].mxu1 %v4600_v16 }
 0x115   : > { %1617 = vmatprep.mubr.bf16.mxu0 %v4601_v17  ;;  %1873 = vmatprep.mubr.bf16.mxu1 %v4603_v18 }
 0x11c   : > { %1618 = vmatmul.mubr.bf16.gmra.mrb[64].mxu0 %v4605_v19  ;;  %1874 = vmatmul.mubr.bf16.gmra.mrb[64].mxu1 %v4606_v20 }
 0x11d   : > { %1625 = vmatprep.mubr.bf16.mxu0 %v4607_v21  ;;  %1881 = vmatprep.mubr.bf16.mxu1 %v4609_v22 }
 0x124   : > { %1626 = vmatmul.mubr.bf16.gmra.mrb[68].mxu0 %v4611_v23  ;;  %1882 = vmatmul.mubr.bf16.gmra.mrb[68].mxu1 %v4612_v24 }
 0x125   : > { %1633 = vmatprep.mubr.bf16.mxu0 %v4613_v25  ;;  %1889 = vmatprep.mubr.bf16.mxu1 %v4615_v26 }
 0x12c   : > { %1634 = vmatmul.mubr.bf16.gmra.mrb[72].mxu0 %v4617_v27  ;;  %1890 = vmatmul.mubr.bf16.gmra.mrb[72].mxu1 %v4618_v28 }
 0x12d   : > { %1641 = vmatprep.mubr.bf16.mxu0 %v4619_v29  ;;  %1897 = vmatprep.mubr.bf16.mxu1 %v4621_v30 }
 0x134   : > { %1642 = vmatmul.mubr.bf16.gmra.mrb[76].mxu0 %v4623_v31  ;;  %1898 = vmatmul.mubr.bf16.gmra.mrb[76].mxu1 %v4624_v32 }
 0x135   : > { %1649 = vmatprep.mubr.bf16.mxu0 %v4625_v33  ;;  %1905 = vmatprep.mubr.bf16.mxu1 %v4627_v34  ;;  %v4677_v33 = vld [vmem:[%s5036_s29 + $0x1c0] ss:$8 sps:$4 sm:$0xff]  }
 0x136   : > { %v4678_v34 = vld [vmem:[%s5036_s29 + $0x3c0] ss:$8 sps:$4 sm:$0xff]  }
 0x13c   : > { %1650 = vmatmul.mubr.bf16.gmra.mrb[80].mxu0 %v4629_v35  ;;  %1906 = vmatmul.mubr.bf16.gmra.mrb[80].mxu1 %v4630_v36 }
 0x13d   : > { %1657 = vmatprep.mubr.bf16.mxu0 %v4631_v37  ;;  %1913 = vmatprep.mubr.bf16.mxu1 %v4633_v38  ;;  %v4679_v37 = vld [vmem:[%s5036_s29 + $0x1d4] ss:$8 sps:$4 sm:$0xff]  }
 0x13e   : > { %v4681_v38 = vld [vmem:[%s5036_s29 + $0x3d4] ss:$8 sps:$4 sm:$0xff]  }
 0x144   : > { %1658 = vmatmul.mubr.bf16.gmra.mrb[84].mxu0 %v4635_v39  ;;  %1914 = vmatmul.mubr.bf16.gmra.mrb[84].mxu1 %v4636_v40 }
 0x145   : > { %1665 = vmatprep.mubr.bf16.mxu0 %v4637_v41  ;;  %1921 = vmatprep.mubr.bf16.mxu1 %v4639_v42 }
 0x14c   : > { %1666 = vmatmul.mubr.bf16.gmra.mrb[88].mxu0 %v4641_v43  ;;  %1922 = vmatmul.mubr.bf16.gmra.mrb[88].mxu1 %v4642_v44 }
 0x14d   : > { %1673 = vmatprep.mubr.bf16.mxu0 %v4643_v45  ;;  %1929 = vmatprep.mubr.bf16.mxu1 %v4645_v46 }
 0x154   : > { %1674 = vmatmul.mubr.bf16.gmra.mrb[92].mxu0 %v4647_v47  ;;  %1930 = vmatmul.mubr.bf16.gmra.mrb[92].mxu1 %v4648_v48 }
 0x155   : > { %1681 = vmatprep.mubr.bf16.mxu0 %v4649_v49  ;;  %1937 = vmatprep.mubr.bf16.mxu1 %v4651_v50 }
 0x15c   : > { %1682 = vmatmul.mubr.bf16.gmra.mrb[96].mxu0 %v4653_v51  ;;  %1938 = vmatmul.mubr.bf16.gmra.mrb[96].mxu1 %v4654_v52 }
 0x15d   : > { %1689 = vmatprep.mubr.bf16.mxu0 %v4655_v53  ;;  %1945 = vmatprep.mubr.bf16.mxu1 %v4657_v54 }
 0x164   : > { %1690 = vmatmul.mubr.bf16.gmra.mrb[100].mxu0 %v4659_v55  ;;  %1946 = vmatmul.mubr.bf16.gmra.mrb[100].mxu1 %v4660_v56 }
 0x165   : > { %1697 = vmatprep.mubr.bf16.mxu0 %v4661_v57  ;;  %1953 = vmatprep.mubr.bf16.mxu1 %v4663_v58 }
 0x16c   : > { %1698 = vmatmul.mubr.bf16.gmra.mrb[104].mxu0 %v4665_v59  ;;  %1954 = vmatmul.mubr.bf16.gmra.mrb[104].mxu1 %v4666_v60  ;;  %v4683_v59 = vld [vmem:[%s5036_s29 + $0x1d0] ss:$8 sps:$4 sm:$0xff]  }
 0x16d   : > { %1705 = vmatprep.mubr.bf16.mxu0 %v4667_v61  ;;  %1961 = vmatprep.mubr.bf16.mxu1 %v4669_v62  ;;  %v4684_v60 = vld [vmem:[%s5036_s29 + $0x3d0] ss:$8 sps:$4 sm:$0xff]  }
 0x16f   : > { %v1491_v0 = vpop.f32.mrb[0].mxu0  ;;  %v1747_v2 = vpop.f32.mrb[0].mxu1 }
 0x170   : > { %v2396_v3 = vmul.f32 %v5191_v63, %v1491_v0  ;;  %v2460_v4 = vmul.f32 %v5191_v63, %v1747_v2  ;;  %v1493_v5 = vpop.f32.mrb[1].mxu0  ;;  %v1749_v6 = vpop.f32.mrb[1].mxu1  ;;  %v4685_v0 = vld [vmem:[%s5036_s29 + $0x1e4] ss:$8 sps:$4 sm:$0xff]  }
 0x171   : > { %v1494_v9 = vpop.f32.mrb[2].mxu0  ;;  %v1750_v10 = vpop.f32.mrb[2].mxu1  ;;  %v4687_v2 = vld [vmem:[%s5036_s29 + $0x3e4] ss:$8 sps:$4 sm:$0xff]  }
 0x172   : > { %v2531_v13 = vadd.f32 %v5196_v1, %v2396_v3  ;;  %v2595_v14 = vadd.f32 %v5196_v1, %v2460_v4  ;;  %v2397_v15 = vmul.f32 %v5191_v63, %v1494_v9  ;;  %v2461_v16 = vmul.f32 %v5191_v63, %v1750_v10  ;;  %v1496_v17 = vpop.f32.mrb[3].mxu0  ;;  %v1752_v18 = vpop.f32.mrb[3].mxu1 }
 0x174   : > { %v2532_v19 = vadd.f32 %v5196_v1, %v2397_v15  ;;  %v2596_v20 = vadd.f32 %v5196_v1, %v2461_v16  ;;  %1706 = vmatmul.mubr.bf16.gmra.mrb[108].mxu0 %v4671_v7  ;;  %1962 = vmatmul.mubr.bf16.gmra.mrb[108].mxu1 %v4672_v8  ;;  %v2659_v21 = vmax.f32 %v2531_v13, 0.0  ;;  %v2723_v22 = vmax.f32 %v2595_v14, 0.0 }
 0x175   : > { %1713 = vmatprep.mubr.bf16.mxu0 %v4673_v11  ;;  %1969 = vmatprep.mubr.bf16.mxu1 %v4675_v12 }
 0x176   : > { %v2660_v23 = vmax.f32 %v2532_v19, 0.0  ;;  %v2724_v24 = vmax.f32 %v2596_v20, 0.0 }
 0x177   : > { %v1499_v25 = vpop.f32.mrb[4].mxu0  ;;  %v1755_v26 = vpop.f32.mrb[4].mxu1 }
 0x178   : > { %v3997_v27 = vpack.c.bf16 %v2660_v23, %v2659_v21  ;;  %v4157_v28 = vpack.c.bf16 %v2724_v24, %v2723_v22  ;;  %v2398_v29 = vmul.f32 %v5191_v63, %v1499_v25  ;;  %v2462_v30 = vmul.f32 %v5191_v63, %v1755_v26  ;;  %v1501_v31 = vpop.f32.mrb[5].mxu0  ;;  %v1757_v32 = vpop.f32.mrb[5].mxu1  ;;  %v4689_v23 = vld [vmem:[%s5036_s29 + $0x1e0] ss:$8 sps:$4 sm:$0xff]  }
 0x179   : > { %v1502_v35 = vpop.f32.mrb[6].mxu0  ;;  %v1758_v36 = vpop.f32.mrb[6].mxu1  ;;  %v4690_v24 = vld [vmem:[%s5036_s29 + $0x3e0] ss:$8 sps:$4 sm:$0xff]  }
 0x17a   : > { %3998 = vst [vmem:[%s5217_s22] sm:$0xff] %v3997_v27   ;;  %4345 = vst [vmem:[%s5217_s22 + $0x100] sm:$0xff] %v4157_v28   ;;  %v2533_v39 = vadd.f32 %v5196_v1, %v2398_v29  ;;  %v2597_v40 = vadd.f32 %v5196_v1, %v2462_v30  ;;  %v2399_v41 = vmul.f32 %v5191_v63, %v1502_v35  ;;  %v1504_v43 = vpop.f32.mrb[7].mxu0  ;;  %v1760_v44 = vpop.f32.mrb[7].mxu1  ;;  %v4691_v27 = vld [vmem:[%s5036_s29 + $0x1f4] ss:$8 sps:$4 sm:$0xff]  }
 0x17b   : > { %v2463_v42 = vmul.f32 %v5191_v63, %v1758_v36  ;;  %v4693_v28 = vld [vmem:[%s5036_s29 + $0x3f4] ss:$8 sps:$4 sm:$0xff]  }
 0x17c   : > { %v2534_v45 = vadd.f32 %v5196_v1, %v2399_v41  ;;  %1714 = vmatmul.mubr.bf16.gmra.mrb[112].mxu0 %v4677_v33  ;;  %1970 = vmatmul.mubr.bf16.gmra.mrb[112].mxu1 %v4678_v34  ;;  %v2661_v47 = vmax.f32 %v2533_v39, 0.0  ;;  %v2725_v48 = vmax.f32 %v2597_v40, 0.0 }
 0x17d   : > { %v2598_v46 = vadd.f32 %v5196_v1, %v2463_v42  ;;  %1721 = vmatprep.mubr.bf16.mxu0 %v4679_v37  ;;  %1977 = vmatprep.mubr.bf16.mxu1 %v4681_v38 }
 0x17e   : > { %v2662_v49 = vmax.f32 %v2534_v45, 0.0 }
 0x17f   : > { %v2726_v50 = vmax.f32 %v2598_v46, 0.0  ;;  %v1507_v51 = vpop.f32.mrb[8].mxu0  ;;  %v1763_v52 = vpop.f32.mrb[8].mxu1 }
 0x180   : > { %v4002_v53 = vpack.c.bf16 %v2662_v49, %v2661_v47  ;;  %v2400_v55 = vmul.f32 %v5191_v63, %v1507_v51  ;;  %v2464_v56 = vmul.f32 %v5191_v63, %v1763_v52  ;;  %v1509_v57 = vpop.f32.mrb[9].mxu0  ;;  %v1765_v58 = vpop.f32.mrb[9].mxu1  ;;  %v4695_v49 = vld [vmem:[%s5036_s29 + $0x1f0] ss:$8 sps:$4 sm:$0xff]  }
 0x181   : > { %v4162_v54 = vpack.c.bf16 %v2726_v50, %v2725_v48  ;;  %v1510_v61 = vpop.f32.mrb[10].mxu0  ;;  %v1766_v62 = vpop.f32.mrb[10].mxu1  ;;  %v4696_v50 = vld [vmem:[%s5036_s29 + $0x3f0] ss:$8 sps:$4 sm:$0xff]   ;;  %s5552_s29 = scalar_lea.hbm %s5609_s4, %s3993_s6 }
 0x182   : > { %4314 = vst [vmem:[%s5217_s22 + $0x8] sm:$0xff] %v4002_v53   ;;  %v2535_v3 = vadd.f32 %v5196_v1, %v2400_v55  ;;  %v2599_v4 = vadd.f32 %v5196_v1, %v2464_v56  ;;  %v2401_v5 = vmul.f32 %v5191_v63, %v1510_v61  ;;  %v2465_v6 = vmul.f32 %v5191_v63, %v1766_v62  ;;  %v1512_v7 = vpop.f32.mrb[11].mxu0  ;;  %v1768_v8 = vpop.f32.mrb[11].mxu1 }
 0x183   : > { %4346 = vst [vmem:[%s5217_s22 + $0x108] sm:$0xff] %v4162_v54  }
 0x184   : > { %v2536_v9 = vadd.f32 %v5196_v1, %v2401_v5  ;;  %v2600_v10 = vadd.f32 %v5196_v1, %v2465_v6  ;;  %1722 = vmatmul.mubr.bf16.gmra.mrb[116].mxu0 %v4683_v59  ;;  %1978 = vmatmul.mubr.bf16.gmra.mrb[116].mxu1 %v4684_v60  ;;  %v2663_v11 = vmax.f32 %v2535_v3, 0.0  ;;  %v2727_v12 = vmax.f32 %v2599_v4, 0.0 }
 0x185   : > { %1729 = vmatprep.mubr.bf16.mxu0 %v4685_v0  ;;  %1985 = vmatprep.mubr.bf16.mxu1 %v4687_v2 }
 0x186   : > { %v2664_v13 = vmax.f32 %v2536_v9, 0.0  ;;  %v2728_v14 = vmax.f32 %v2600_v10, 0.0 }
 0x187   : > { %v1515_v15 = vpop.f32.mrb[12].mxu0  ;;  %v1771_v16 = vpop.f32.mrb[12].mxu1 }
 0x188   : > { %v4007_v17 = vpack.c.bf16 %v2664_v13, %v2663_v11  ;;  %v4167_v18 = vpack.c.bf16 %v2728_v14, %v2727_v12  ;;  %v2402_v19 = vmul.f32 %v5191_v63, %v1515_v15  ;;  %v2466_v20 = vmul.f32 %v5191_v63, %v1771_v16  ;;  %v1517_v21 = vpop.f32.mrb[13].mxu0  ;;  %v1773_v22 = vpop.f32.mrb[13].mxu1 }
 0x189   : > { %v1518_v25 = vpop.f32.mrb[14].mxu0  ;;  %v1774_v26 = vpop.f32.mrb[14].mxu1 }
 0x18a   : > { %4315 = vst [vmem:[%s5217_s22 + $0x10] sm:$0xff] %v4007_v17   ;;  %4347 = vst [vmem:[%s5217_s22 + $0x110] sm:$0xff] %v4167_v18   ;;  %v2537_v29 = vadd.f32 %v5196_v1, %v2402_v19  ;;  %v2601_v30 = vadd.f32 %v5196_v1, %v2466_v20  ;;  %v2403_v31 = vmul.f32 %v5191_v63, %v1518_v25  ;;  %v1520_v33 = vpop.f32.mrb[15].mxu0  ;;  %v1776_v34 = vpop.f32.mrb[15].mxu1 }
 0x18b   : > { %v2467_v32 = vmul.f32 %v5191_v63, %v1774_v26 }
 0x18c   : > { %v2538_v35 = vadd.f32 %v5196_v1, %v2403_v31  ;;  %1730 = vmatmul.mubr.bf16.gmra.mrb[120].mxu0 %v4689_v23  ;;  %1986 = vmatmul.mubr.bf16.gmra.mrb[120].mxu1 %v4690_v24  ;;  %v2665_v37 = vmax.f32 %v2537_v29, 0.0  ;;  %v2729_v38 = vmax.f32 %v2601_v30, 0.0 }
 0x18d   : > { %v2602_v36 = vadd.f32 %v5196_v1, %v2467_v32  ;;  %1737 = vmatprep.mubr.bf16.mxu0 %v4691_v27  ;;  %1993 = vmatprep.mubr.bf16.mxu1 %v4693_v28 }
 0x18e   : > { %v2666_v39 = vmax.f32 %v2538_v35, 0.0 }
 0x18f   : > { %v2730_v40 = vmax.f32 %v2602_v36, 0.0  ;;  %v1523_v41 = vpop.f32.mrb[16].mxu0  ;;  %v1779_v42 = vpop.f32.mrb[16].mxu1 }
 0x190   : > { %v4012_v43 = vpack.c.bf16 %v2666_v39, %v2665_v37  ;;  %v2404_v45 = vmul.f32 %v5191_v63, %v1523_v41  ;;  %v2468_v46 = vmul.f32 %v5191_v63, %v1779_v42  ;;  %v1525_v47 = vpop.f32.mrb[17].mxu0  ;;  %v1781_v48 = vpop.f32.mrb[17].mxu1 }
 0x191   : > { %v4172_v44 = vpack.c.bf16 %v2730_v40, %v2729_v38  ;;  %v1526_v51 = vpop.f32.mrb[18].mxu0  ;;  %v1782_v52 = vpop.f32.mrb[18].mxu1 }
 0x192   : > { %4316 = vst [vmem:[%s5217_s22 + $0x18] sm:$0xff] %v4012_v43   ;;  %v2539_v53 = vadd.f32 %v5196_v1, %v2404_v45  ;;  %v2603_v54 = vadd.f32 %v5196_v1, %v2468_v46  ;;  %v2405_v55 = vmul.f32 %v5191_v63, %v1526_v51  ;;  %v2469_v56 = vmul.f32 %v5191_v63, %v1782_v52  ;;  %v1528_v57 = vpop.f32.mrb[19].mxu0  ;;  %v1784_v58 = vpop.f32.mrb[19].mxu1 }
 0x193   : > { %4348 = vst [vmem:[%s5217_s22 + $0x118] sm:$0xff] %v4172_v44  }
 0x194   : > { %v2540_v59 = vadd.f32 %v5196_v1, %v2405_v55  ;;  %v2604_v60 = vadd.f32 %v5196_v1, %v2469_v56  ;;  %1738 = vmatmul.mubr.bf16.gmra.mrb[124].mxu0 %v4695_v49  ;;  %1994 = vmatmul.mubr.bf16.gmra.mrb[124].mxu1 %v4696_v50  ;;  %v2667_v61 = vmax.f32 %v2539_v53, 0.0  ;;  %v2731_v62 = vmax.f32 %v2603_v54, 0.0 }
 0x196   : > { %v2668_v0 = vmax.f32 %v2540_v59, 0.0  ;;  %v2732_v2 = vmax.f32 %v2604_v60, 0.0 }
 0x197   : > { %v1531_v3 = vpop.f32.mrb[20].mxu0  ;;  %v1787_v4 = vpop.f32.mrb[20].mxu1 }
 0x198   : > { %v4017_v5 = vpack.c.bf16 %v2668_v0, %v2667_v61  ;;  %v4177_v6 = vpack.c.bf16 %v2732_v2, %v2731_v62  ;;  %v2406_v7 = vmul.f32 %v5191_v63, %v1531_v3  ;;  %v2470_v8 = vmul.f32 %v5191_v63, %v1787_v4  ;;  %v1533_v9 = vpop.f32.mrb[21].mxu0  ;;  %v1789_v10 = vpop.f32.mrb[21].mxu1 }
 0x199   : > { %v1534_v11 = vpop.f32.mrb[22].mxu0  ;;  %v1790_v12 = vpop.f32.mrb[22].mxu1 }
 0x19a   : > { %4317 = vst [vmem:[%s5217_s22 + $0x20] sm:$0xff] %v4017_v5   ;;  %4349 = vst [vmem:[%s5217_s22 + $0x120] sm:$0xff] %v4177_v6   ;;  %v2541_v13 = vadd.f32 %v5196_v1, %v2406_v7  ;;  %v2605_v14 = vadd.f32 %v5196_v1, %v2470_v8  ;;  %v2407_v15 = vmul.f32 %v5191_v63, %v1534_v11  ;;  %v1536_v17 = vpop.f32.mrb[23].mxu0  ;;  %v1792_v18 = vpop.f32.mrb[23].mxu1 }
 0x19b   : > { %v2471_v16 = vmul.f32 %v5191_v63, %v1790_v12 }
 0x19c   : > { %v2542_v19 = vadd.f32 %v5196_v1, %v2407_v15  ;;  %v2669_v21 = vmax.f32 %v2541_v13, 0.0  ;;  %v2733_v22 = vmax.f32 %v2605_v14, 0.0 }
 0x19d   : > { %v2606_v20 = vadd.f32 %v5196_v1, %v2471_v16 }
 0x19e   : > { %v2670_v23 = vmax.f32 %v2542_v19, 0.0 }
 0x19f   : > { %v2734_v24 = vmax.f32 %v2606_v20, 0.0  ;;  %v1539_v25 = vpop.f32.mrb[24].mxu0  ;;  %v1795_v26 = vpop.f32.mrb[24].mxu1 }
 0x1a0   : > { %v4022_v27 = vpack.c.bf16 %v2670_v23, %v2669_v21  ;;  %v2408_v29 = vmul.f32 %v5191_v63, %v1539_v25  ;;  %v2472_v30 = vmul.f32 %v5191_v63, %v1795_v26  ;;  %v1541_v31 = vpop.f32.mrb[25].mxu0  ;;  %v1797_v32 = vpop.f32.mrb[25].mxu1 }
 0x1a1   : > { %v4182_v28 = vpack.c.bf16 %v2734_v24, %v2733_v22  ;;  %v1542_v33 = vpop.f32.mrb[26].mxu0  ;;  %v1798_v34 = vpop.f32.mrb[26].mxu1 }
 0x1a2   : > { %4318 = vst [vmem:[%s5217_s22 + $0x28] sm:$0xff] %v4022_v27   ;;  %v2543_v35 = vadd.f32 %v5196_v1, %v2408_v29  ;;  %v2607_v36 = vadd.f32 %v5196_v1, %v2472_v30  ;;  %v2409_v37 = vmul.f32 %v5191_v63, %v1542_v33  ;;  %v2473_v38 = vmul.f32 %v5191_v63, %v1798_v34  ;;  %v1544_v39 = vpop.f32.mrb[27].mxu0  ;;  %v1800_v40 = vpop.f32.mrb[27].mxu1 }
 0x1a3   : > { %4350 = vst [vmem:[%s5217_s22 + $0x128] sm:$0xff] %v4182_v28  }
 0x1a4   : > { %v2544_v41 = vadd.f32 %v5196_v1, %v2409_v37  ;;  %v2608_v42 = vadd.f32 %v5196_v1, %v2473_v38  ;;  %v2671_v43 = vmax.f32 %v2543_v35, 0.0  ;;  %v2735_v44 = vmax.f32 %v2607_v36, 0.0 }
 0x1a6   : > { %v2672_v45 = vmax.f32 %v2544_v41, 0.0  ;;  %v2736_v46 = vmax.f32 %v2608_v42, 0.0 }
 0x1a7   : > { %v1547_v47 = vpop.f32.mrb[28].mxu0  ;;  %v1803_v48 = vpop.f32.mrb[28].mxu1 }
 0x1a8   : > { %v4027_v49 = vpack.c.bf16 %v2672_v45, %v2671_v43  ;;  %v4187_v50 = vpack.c.bf16 %v2736_v46, %v2735_v44  ;;  %v2410_v51 = vmul.f32 %v5191_v63, %v1547_v47  ;;  %v2474_v52 = vmul.f32 %v5191_v63, %v1803_v48  ;;  %v1549_v53 = vpop.f32.mrb[29].mxu0  ;;  %v1805_v54 = vpop.f32.mrb[29].mxu1 }
 0x1a9   : > { %v1550_v55 = vpop.f32.mrb[30].mxu0  ;;  %v1806_v56 = vpop.f32.mrb[30].mxu1 }
 0x1aa   : > { %4319 = vst [vmem:[%s5217_s22 + $0x30] sm:$0xff] %v4027_v49   ;;  %4351 = vst [vmem:[%s5217_s22 + $0x130] sm:$0xff] %v4187_v50   ;;  %v2545_v57 = vadd.f32 %v5196_v1, %v2410_v51  ;;  %v2609_v58 = vadd.f32 %v5196_v1, %v2474_v52  ;;  %v2411_v59 = vmul.f32 %v5191_v63, %v1550_v55  ;;  %v1552_v61 = vpop.f32.mrb[31].mxu0  ;;  %v1808_v62 = vpop.f32.mrb[31].mxu1 }
 0x1ab   : > { %v2475_v60 = vmul.f32 %v5191_v63, %v1806_v56 }
 0x1ac   : > { %v2546_v0 = vadd.f32 %v5196_v1, %v2411_v59  ;;  %v2673_v3 = vmax.f32 %v2545_v57, 0.0  ;;  %v2737_v4 = vmax.f32 %v2609_v58, 0.0 }
 0x1ad   : > { %v2610_v2 = vadd.f32 %v5196_v1, %v2475_v60 }
 0x1ae   : > { %v2674_v5 = vmax.f32 %v2546_v0, 0.0 }
 0x1af   : > { %v2738_v6 = vmax.f32 %v2610_v2, 0.0  ;;  %v1555_v7 = vpop.f32.mrb[32].mxu0  ;;  %v1811_v8 = vpop.f32.mrb[32].mxu1 }
 0x1b0   : > { %v4032_v9 = vpack.c.bf16 %v2674_v5, %v2673_v3  ;;  %v2412_v11 = vmul.f32 %v5191_v63, %v1555_v7  ;;  %v2476_v12 = vmul.f32 %v5191_v63, %v1811_v8  ;;  %v1557_v13 = vpop.f32.mrb[33].mxu0  ;;  %v1813_v14 = vpop.f32.mrb[33].mxu1 }
 0x1b1   : > { %v4192_v10 = vpack.c.bf16 %v2738_v6, %v2737_v4  ;;  %v1558_v15 = vpop.f32.mrb[34].mxu0  ;;  %v1814_v16 = vpop.f32.mrb[34].mxu1 }
 0x1b2   : > { %4320 = vst [vmem:[%s5217_s22 + $0x38] sm:$0xff] %v4032_v9   ;;  %v2547_v17 = vadd.f32 %v5196_v1, %v2412_v11  ;;  %v2611_v18 = vadd.f32 %v5196_v1, %v2476_v12  ;;  %v2413_v19 = vmul.f32 %v5191_v63, %v1558_v15  ;;  %v2477_v20 = vmul.f32 %v5191_v63, %v1814_v16  ;;  %v1560_v21 = vpop.f32.mrb[35].mxu0  ;;  %v1816_v22 = vpop.f32.mrb[35].mxu1 }
 0x1b3   : > { %4352 = vst [vmem:[%s5217_s22 + $0x138] sm:$0xff] %v4192_v10  }
 0x1b4   : > { %v2548_v23 = vadd.f32 %v5196_v1, %v2413_v19  ;;  %v2612_v24 = vadd.f32 %v5196_v1, %v2477_v20  ;;  %v2675_v25 = vmax.f32 %v2547_v17, 0.0  ;;  %v2739_v26 = vmax.f32 %v2611_v18, 0.0 }
 0x1b6   : > { %v2676_v27 = vmax.f32 %v2548_v23, 0.0  ;;  %v2740_v28 = vmax.f32 %v2612_v24, 0.0 }
 0x1b7   : > { %v1563_v29 = vpop.f32.mrb[36].mxu0  ;;  %v1819_v30 = vpop.f32.mrb[36].mxu1 }
 0x1b8   : > { %v4037_v31 = vpack.c.bf16 %v2676_v27, %v2675_v25  ;;  %v4197_v32 = vpack.c.bf16 %v2740_v28, %v2739_v26  ;;  %v2414_v33 = vmul.f32 %v5191_v63, %v1563_v29  ;;  %v2478_v34 = vmul.f32 %v5191_v63, %v1819_v30  ;;  %v1565_v35 = vpop.f32.mrb[37].mxu0  ;;  %v1821_v36 = vpop.f32.mrb[37].mxu1 }
 0x1b9   : > { %v1566_v37 = vpop.f32.mrb[38].mxu0  ;;  %v1822_v38 = vpop.f32.mrb[38].mxu1 }
 0x1ba   : > { %4321 = vst [vmem:[%s5217_s22 + $0x40] sm:$0xff] %v4037_v31   ;;  %4353 = vst [vmem:[%s5217_s22 + $0x140] sm:$0xff] %v4197_v32   ;;  %v2549_v39 = vadd.f32 %v5196_v1, %v2414_v33  ;;  %v2613_v40 = vadd.f32 %v5196_v1, %v2478_v34  ;;  %v2415_v41 = vmul.f32 %v5191_v63, %v1566_v37  ;;  %v1568_v43 = vpop.f32.mrb[39].mxu0  ;;  %v1824_v44 = vpop.f32.mrb[39].mxu1 }
 0x1bb   : > { %v2479_v42 = vmul.f32 %v5191_v63, %v1822_v38 }
 0x1bc   : > { %v2550_v45 = vadd.f32 %v5196_v1, %v2415_v41  ;;  %v2677_v47 = vmax.f32 %v2549_v39, 0.0  ;;  %v2741_v48 = vmax.f32 %v2613_v40, 0.0 }
 0x1bd   : > { %v2614_v46 = vadd.f32 %v5196_v1, %v2479_v42 }
 0x1be   : > { %v2678_v49 = vmax.f32 %v2550_v45, 0.0 }
 0x1bf   : > { %v2742_v50 = vmax.f32 %v2614_v46, 0.0  ;;  %v1571_v51 = vpop.f32.mrb[40].mxu0  ;;  %v1827_v52 = vpop.f32.mrb[40].mxu1 }
 0x1c0   : > { %v4042_v53 = vpack.c.bf16 %v2678_v49, %v2677_v47  ;;  %v2416_v55 = vmul.f32 %v5191_v63, %v1571_v51  ;;  %v2480_v56 = vmul.f32 %v5191_v63, %v1827_v52  ;;  %v1573_v57 = vpop.f32.mrb[41].mxu0  ;;  %v1829_v58 = vpop.f32.mrb[41].mxu1 }
 0x1c1   : > { %v4202_v54 = vpack.c.bf16 %v2742_v50, %v2741_v48  ;;  %v1574_v59 = vpop.f32.mrb[42].mxu0  ;;  %v1830_v60 = vpop.f32.mrb[42].mxu1 }
 0x1c2   : > { %4322 = vst [vmem:[%s5217_s22 + $0x48] sm:$0xff] %v4042_v53   ;;  %v2551_v61 = vadd.f32 %v5196_v1, %v2416_v55  ;;  %v2615_v62 = vadd.f32 %v5196_v1, %v2480_v56  ;;  %v2417_v0 = vmul.f32 %v5191_v63, %v1574_v59  ;;  %v2481_v2 = vmul.f32 %v5191_v63, %v1830_v60  ;;  %v1576_v3 = vpop.f32.mrb[43].mxu0  ;;  %v1832_v4 = vpop.f32.mrb[43].mxu1 }
 0x1c3   : > { %4354 = vst [vmem:[%s5217_s22 + $0x148] sm:$0xff] %v4202_v54  }
 0x1c4   : > { %v2552_v5 = vadd.f32 %v5196_v1, %v2417_v0  ;;  %v2616_v6 = vadd.f32 %v5196_v1, %v2481_v2  ;;  %v2679_v7 = vmax.f32 %v2551_v61, 0.0  ;;  %v2743_v8 = vmax.f32 %v2615_v62, 0.0 }
 0x1c6   : > { %v2680_v9 = vmax.f32 %v2552_v5, 0.0  ;;  %v2744_v10 = vmax.f32 %v2616_v6, 0.0 }
 0x1c7   : > { %v1579_v11 = vpop.f32.mrb[44].mxu0  ;;  %v1835_v12 = vpop.f32.mrb[44].mxu1 }
 0x1c8   : > { %v4047_v13 = vpack.c.bf16 %v2680_v9, %v2679_v7  ;;  %v4207_v14 = vpack.c.bf16 %v2744_v10, %v2743_v8  ;;  %v2418_v15 = vmul.f32 %v5191_v63, %v1579_v11  ;;  %v2482_v16 = vmul.f32 %v5191_v63, %v1835_v12  ;;  %v1581_v17 = vpop.f32.mrb[45].mxu0  ;;  %v1837_v18 = vpop.f32.mrb[45].mxu1 }
 0x1c9   : > { %v1582_v19 = vpop.f32.mrb[46].mxu0  ;;  %v1838_v20 = vpop.f32.mrb[46].mxu1 }
 0x1ca   : > { %4323 = vst [vmem:[%s5217_s22 + $0x50] sm:$0xff] %v4047_v13   ;;  %4355 = vst [vmem:[%s5217_s22 + $0x150] sm:$0xff] %v4207_v14   ;;  %v2553_v21 = vadd.f32 %v5196_v1, %v2418_v15  ;;  %v2617_v22 = vadd.f32 %v5196_v1, %v2482_v16  ;;  %v2419_v23 = vmul.f32 %v5191_v63, %v1582_v19  ;;  %v1584_v25 = vpop.f32.mrb[47].mxu0  ;;  %v1840_v26 = vpop.f32.mrb[47].mxu1 }
 0x1cb   : > { %v2483_v24 = vmul.f32 %v5191_v63, %v1838_v20 }
 0x1cc   : > { %v2554_v27 = vadd.f32 %v5196_v1, %v2419_v23  ;;  %v2681_v29 = vmax.f32 %v2553_v21, 0.0  ;;  %v2745_v30 = vmax.f32 %v2617_v22, 0.0 }
 0x1cd   : > { %v2618_v28 = vadd.f32 %v5196_v1, %v2483_v24 }
 0x1ce   : > { %v2682_v31 = vmax.f32 %v2554_v27, 0.0 }
 0x1cf   : > { %v2746_v32 = vmax.f32 %v2618_v28, 0.0  ;;  %v1587_v33 = vpop.f32.mrb[48].mxu0  ;;  %v1843_v34 = vpop.f32.mrb[48].mxu1 }
 0x1d0   : > { %v4052_v35 = vpack.c.bf16 %v2682_v31, %v2681_v29  ;;  %v2420_v37 = vmul.f32 %v5191_v63, %v1587_v33  ;;  %v2484_v38 = vmul.f32 %v5191_v63, %v1843_v34  ;;  %v1589_v39 = vpop.f32.mrb[49].mxu0  ;;  %v1845_v40 = vpop.f32.mrb[49].mxu1 }
 0x1d1   : > { %v4212_v36 = vpack.c.bf16 %v2746_v32, %v2745_v30  ;;  %v1590_v41 = vpop.f32.mrb[50].mxu0  ;;  %v1846_v42 = vpop.f32.mrb[50].mxu1 }
 0x1d2   : > { %4324 = vst [vmem:[%s5217_s22 + $0x58] sm:$0xff] %v4052_v35   ;;  %v2555_v43 = vadd.f32 %v5196_v1, %v2420_v37  ;;  %v2619_v44 = vadd.f32 %v5196_v1, %v2484_v38  ;;  %v2421_v45 = vmul.f32 %v5191_v63, %v1590_v41  ;;  %v2485_v46 = vmul.f32 %v5191_v63, %v1846_v42  ;;  %v1592_v47 = vpop.f32.mrb[51].mxu0  ;;  %v1848_v48 = vpop.f32.mrb[51].mxu1 }
 0x1d3   : > { %4356 = vst [vmem:[%s5217_s22 + $0x158] sm:$0xff] %v4212_v36  }
 0x1d4   : > { %v2556_v49 = vadd.f32 %v5196_v1, %v2421_v45  ;;  %v2620_v50 = vadd.f32 %v5196_v1, %v2485_v46  ;;  %v2683_v51 = vmax.f32 %v2555_v43, 0.0  ;;  %v2747_v52 = vmax.f32 %v2619_v44, 0.0 }
 0x1d6   : > { %v2684_v53 = vmax.f32 %v2556_v49, 0.0  ;;  %v2748_v54 = vmax.f32 %v2620_v50, 0.0 }
 0x1d7   : > { %v1595_v55 = vpop.f32.mrb[52].mxu0  ;;  %v1851_v56 = vpop.f32.mrb[52].mxu1 }
 0x1d8   : > { %v4057_v57 = vpack.c.bf16 %v2684_v53, %v2683_v51  ;;  %v4217_v58 = vpack.c.bf16 %v2748_v54, %v2747_v52  ;;  %v2422_v59 = vmul.f32 %v5191_v63, %v1595_v55  ;;  %v2486_v60 = vmul.f32 %v5191_v63, %v1851_v56  ;;  %v1597_v61 = vpop.f32.mrb[53].mxu0  ;;  %v1853_v62 = vpop.f32.mrb[53].mxu1 }
 0x1d9   : > { %v1598_v0 = vpop.f32.mrb[54].mxu0  ;;  %v1854_v2 = vpop.f32.mrb[54].mxu1 }
 0x1da   : > { %4325 = vst [vmem:[%s5217_s22 + $0x60] sm:$0xff] %v4057_v57   ;;  %4357 = vst [vmem:[%s5217_s22 + $0x160] sm:$0xff] %v4217_v58   ;;  %v2557_v3 = vadd.f32 %v5196_v1, %v2422_v59  ;;  %v2621_v4 = vadd.f32 %v5196_v1, %v2486_v60  ;;  %v2423_v5 = vmul.f32 %v5191_v63, %v1598_v0  ;;  %v1600_v7 = vpop.f32.mrb[55].mxu0  ;;  %v1856_v8 = vpop.f32.mrb[55].mxu1 }
 0x1db   : > { %v2487_v6 = vmul.f32 %v5191_v63, %v1854_v2 }
 0x1dc   : > { %v2558_v9 = vadd.f32 %v5196_v1, %v2423_v5  ;;  %v2685_v11 = vmax.f32 %v2557_v3, 0.0  ;;  %v2749_v12 = vmax.f32 %v2621_v4, 0.0 }
 0x1dd   : > { %v2622_v10 = vadd.f32 %v5196_v1, %v2487_v6 }
 0x1de   : > { %v2686_v13 = vmax.f32 %v2558_v9, 0.0 }
 0x1df   : > { %v2750_v14 = vmax.f32 %v2622_v10, 0.0  ;;  %v1603_v15 = vpop.f32.mrb[56].mxu0  ;;  %v1859_v16 = vpop.f32.mrb[56].mxu1 }
 0x1e0   : > { %v4062_v17 = vpack.c.bf16 %v2686_v13, %v2685_v11  ;;  %v2424_v19 = vmul.f32 %v5191_v63, %v1603_v15  ;;  %v2488_v20 = vmul.f32 %v5191_v63, %v1859_v16  ;;  %v1605_v21 = vpop.f32.mrb[57].mxu0  ;;  %v1861_v22 = vpop.f32.mrb[57].mxu1 }
 0x1e1   : > { %v4222_v18 = vpack.c.bf16 %v2750_v14, %v2749_v12  ;;  %v1606_v23 = vpop.f32.mrb[58].mxu0  ;;  %v1862_v24 = vpop.f32.mrb[58].mxu1 }
 0x1e2   : > { %4326 = vst [vmem:[%s5217_s22 + $0x68] sm:$0xff] %v4062_v17   ;;  %v2559_v25 = vadd.f32 %v5196_v1, %v2424_v19  ;;  %v2623_v26 = vadd.f32 %v5196_v1, %v2488_v20  ;;  %v2425_v27 = vmul.f32 %v5191_v63, %v1606_v23  ;;  %v2489_v28 = vmul.f32 %v5191_v63, %v1862_v24  ;;  %v1608_v29 = vpop.f32.mrb[59].mxu0  ;;  %v1864_v30 = vpop.f32.mrb[59].mxu1 }
 0x1e3   : > { %4358 = vst [vmem:[%s5217_s22 + $0x168] sm:$0xff] %v4222_v18  }
 0x1e4   : > { %v2560_v31 = vadd.f32 %v5196_v1, %v2425_v27  ;;  %v2624_v32 = vadd.f32 %v5196_v1, %v2489_v28  ;;  %v2687_v33 = vmax.f32 %v2559_v25, 0.0  ;;  %v2751_v34 = vmax.f32 %v2623_v26, 0.0 }
 0x1e6   : > { %v2688_v35 = vmax.f32 %v2560_v31, 0.0  ;;  %v2752_v36 = vmax.f32 %v2624_v32, 0.0 }
 0x1e7   : > { %v1611_v37 = vpop.f32.mrb[60].mxu0  ;;  %v1867_v38 = vpop.f32.mrb[60].mxu1 }
 0x1e8   : > { %v4067_v39 = vpack.c.bf16 %v2688_v35, %v2687_v33  ;;  %v4227_v40 = vpack.c.bf16 %v2752_v36, %v2751_v34  ;;  %v2426_v41 = vmul.f32 %v5191_v63, %v1611_v37  ;;  %v2490_v42 = vmul.f32 %v5191_v63, %v1867_v38  ;;  %v1613_v43 = vpop.f32.mrb[61].mxu0  ;;  %v1869_v44 = vpop.f32.mrb[61].mxu1 }
 0x1e9   : > { %v1614_v45 = vpop.f32.mrb[62].mxu0  ;;  %v1870_v46 = vpop.f32.mrb[62].mxu1 }
 0x1ea   : > { %4327 = vst [vmem:[%s5217_s22 + $0x70] sm:$0xff] %v4067_v39   ;;  %4359 = vst [vmem:[%s5217_s22 + $0x170] sm:$0xff] %v4227_v40   ;;  %v2561_v47 = vadd.f32 %v5196_v1, %v2426_v41  ;;  %v2625_v48 = vadd.f32 %v5196_v1, %v2490_v42  ;;  %v2427_v49 = vmul.f32 %v5191_v63, %v1614_v45  ;;  %v1616_v51 = vpop.f32.mrb[63].mxu0  ;;  %v1872_v52 = vpop.f32.mrb[63].mxu1 }
 0x1eb   : > { %v2491_v50 = vmul.f32 %v5191_v63, %v1870_v46 }
 0x1ec   : > { %v2562_v53 = vadd.f32 %v5196_v1, %v2427_v49  ;;  %v2689_v55 = vmax.f32 %v2561_v47, 0.0  ;;  %v2753_v56 = vmax.f32 %v2625_v48, 0.0 }
 0x1ed   : > { %v2626_v54 = vadd.f32 %v5196_v1, %v2491_v50 }
 0x1ee   : > { %v2690_v57 = vmax.f32 %v2562_v53, 0.0 }
 0x1ef   : > { %v2754_v58 = vmax.f32 %v2626_v54, 0.0  ;;  %v1619_v59 = vpop.f32.mrb[64].mxu0  ;;  %v1875_v60 = vpop.f32.mrb[64].mxu1 }
 0x1f0   : > { %v4072_v61 = vpack.c.bf16 %v2690_v57, %v2689_v55  ;;  %v2428_v0 = vmul.f32 %v5191_v63, %v1619_v59  ;;  %v2492_v2 = vmul.f32 %v5191_v63, %v1875_v60  ;;  %v1621_v3 = vpop.f32.mrb[65].mxu0  ;;  %v1877_v4 = vpop.f32.mrb[65].mxu1 }
 0x1f1   : > { %v4232_v62 = vpack.c.bf16 %v2754_v58, %v2753_v56  ;;  %v1622_v5 = vpop.f32.mrb[66].mxu0  ;;  %v1878_v6 = vpop.f32.mrb[66].mxu1 }
 0x1f2   : > { %4328 = vst [vmem:[%s5217_s22 + $0x78] sm:$0xff] %v4072_v61   ;;  %v2563_v7 = vadd.f32 %v5196_v1, %v2428_v0  ;;  %v2627_v8 = vadd.f32 %v5196_v1, %v2492_v2  ;;  %v2429_v9 = vmul.f32 %v5191_v63, %v1622_v5  ;;  %v2493_v10 = vmul.f32 %v5191_v63, %v1878_v6  ;;  %v1624_v11 = vpop.f32.mrb[67].mxu0  ;;  %v1880_v12 = vpop.f32.mrb[67].mxu1 }
 0x1f3   : > { %4360 = vst [vmem:[%s5217_s22 + $0x178] sm:$0xff] %v4232_v62  }
 0x1f4   : > { %v2564_v13 = vadd.f32 %v5196_v1, %v2429_v9  ;;  %v2628_v14 = vadd.f32 %v5196_v1, %v2493_v10  ;;  %v2691_v15 = vmax.f32 %v2563_v7, 0.0  ;;  %v2755_v16 = vmax.f32 %v2627_v8, 0.0 }
 0x1f6   : > { %v2692_v17 = vmax.f32 %v2564_v13, 0.0  ;;  %v2756_v18 = vmax.f32 %v2628_v14, 0.0 }
 0x1f7   : > { %v1627_v19 = vpop.f32.mrb[68].mxu0  ;;  %v1883_v20 = vpop.f32.mrb[68].mxu1 }
 0x1f8   : > { %v4077_v21 = vpack.c.bf16 %v2692_v17, %v2691_v15  ;;  %v4237_v22 = vpack.c.bf16 %v2756_v18, %v2755_v16  ;;  %v2430_v23 = vmul.f32 %v5191_v63, %v1627_v19  ;;  %v2494_v24 = vmul.f32 %v5191_v63, %v1883_v20  ;;  %v1629_v25 = vpop.f32.mrb[69].mxu0  ;;  %v1885_v26 = vpop.f32.mrb[69].mxu1 }
 0x1f9   : > { %v1630_v27 = vpop.f32.mrb[70].mxu0  ;;  %v1886_v28 = vpop.f32.mrb[70].mxu1 }
 0x1fa   : > { %4329 = vst [vmem:[%s5217_s22 + $0x80] sm:$0xff] %v4077_v21   ;;  %4361 = vst [vmem:[%s5217_s22 + $0x180] sm:$0xff] %v4237_v22   ;;  %v2565_v29 = vadd.f32 %v5196_v1, %v2430_v23  ;;  %v2629_v30 = vadd.f32 %v5196_v1, %v2494_v24  ;;  %v2431_v31 = vmul.f32 %v5191_v63, %v1630_v27  ;;  %v1632_v33 = vpop.f32.mrb[71].mxu0  ;;  %v1888_v34 = vpop.f32.mrb[71].mxu1 }
 0x1fb   : > { %v2495_v32 = vmul.f32 %v5191_v63, %v1886_v28 }
 0x1fc   : > { %v2566_v35 = vadd.f32 %v5196_v1, %v2431_v31  ;;  %v2693_v37 = vmax.f32 %v2565_v29, 0.0  ;;  %v2757_v38 = vmax.f32 %v2629_v30, 0.0 }
 0x1fd   : > { %v2630_v36 = vadd.f32 %v5196_v1, %v2495_v32  ;;  %v5429_v32 = vld [vmem:[%s5608_s3] ss:$0 sm:$0xff] }
 0x1fe   : > { %v2694_v39 = vmax.f32 %v2566_v35, 0.0 }
 0x1ff   : > { %v2758_v40 = vmax.f32 %v2630_v36, 0.0  ;;  %v1635_v41 = vpop.f32.mrb[72].mxu0  ;;  %v1891_v42 = vpop.f32.mrb[72].mxu1 }
 0x200   : > { %v4082_v43 = vpack.c.bf16 %v2694_v39, %v2693_v37  ;;  %v2432_v45 = vmul.f32 %v5191_v63, %v1635_v41  ;;  %v2496_v46 = vmul.f32 %v5191_v63, %v1891_v42  ;;  %v1637_v47 = vpop.f32.mrb[73].mxu0  ;;  %v1893_v48 = vpop.f32.mrb[73].mxu1 }
 0x201   : > { %v4242_v44 = vpack.c.bf16 %v2758_v40, %v2757_v38  ;;  %v1638_v49 = vpop.f32.mrb[74].mxu0  ;;  %v1894_v50 = vpop.f32.mrb[74].mxu1 }
 0x202   : > { %4330 = vst [vmem:[%s5217_s22 + $0x88] sm:$0xff] %v4082_v43   ;;  %v2567_v51 = vadd.f32 %v5196_v1, %v2432_v45  ;;  %v2631_v52 = vadd.f32 %v5196_v1, %v2496_v46  ;;  %v2433_v53 = vmul.f32 %v5191_v63, %v1638_v49  ;;  %v2497_v54 = vmul.f32 %v5191_v63, %v1894_v50  ;;  %v1640_v55 = vpop.f32.mrb[75].mxu0  ;;  %v1896_v56 = vpop.f32.mrb[75].mxu1 }
 0x203   : > { %4362 = vst [vmem:[%s5217_s22 + $0x188] sm:$0xff] %v4242_v44  }
 0x204   : > { %v2568_v57 = vadd.f32 %v5196_v1, %v2433_v53  ;;  %v2632_v58 = vadd.f32 %v5196_v1, %v2497_v54  ;;  %v2695_v59 = vmax.f32 %v2567_v51, 0.0  ;;  %v2759_v60 = vmax.f32 %v2631_v52, 0.0 }
 0x206   : > { %v2696_v61 = vmax.f32 %v2568_v57, 0.0  ;;  %v2760_v62 = vmax.f32 %v2632_v58, 0.0 }
 0x207   : > { %v1643_v0 = vpop.f32.mrb[76].mxu0  ;;  %v1899_v2 = vpop.f32.mrb[76].mxu1 }
 0x208   : > { %v4087_v3 = vpack.c.bf16 %v2696_v61, %v2695_v59  ;;  %v4247_v4 = vpack.c.bf16 %v2760_v62, %v2759_v60  ;;  %v2434_v5 = vmul.f32 %v5191_v63, %v1643_v0  ;;  %v2498_v6 = vmul.f32 %v5191_v63, %v1899_v2  ;;  %v1645_v7 = vpop.f32.mrb[77].mxu0  ;;  %v1901_v8 = vpop.f32.mrb[77].mxu1 }
 0x209   : > { %v1646_v9 = vpop.f32.mrb[78].mxu0  ;;  %v1902_v10 = vpop.f32.mrb[78].mxu1 }
 0x20a   : > { %4331 = vst [vmem:[%s5217_s22 + $0x90] sm:$0xff] %v4087_v3   ;;  %4363 = vst [vmem:[%s5217_s22 + $0x190] sm:$0xff] %v4247_v4   ;;  %v2569_v11 = vadd.f32 %v5196_v1, %v2434_v5  ;;  %v2633_v12 = vadd.f32 %v5196_v1, %v2498_v6  ;;  %v2435_v13 = vmul.f32 %v5191_v63, %v1646_v9  ;;  %v1648_v15 = vpop.f32.mrb[79].mxu0  ;;  %v1904_v16 = vpop.f32.mrb[79].mxu1 }
 0x20b   : > { %v2499_v14 = vmul.f32 %v5191_v63, %v1902_v10  ;;  %v5420_v63 = vld [vmem:[%s5607_s2] ss:$0 sm:$0xff] }
 0x20c   : > { %v2570_v17 = vadd.f32 %v5196_v1, %v2435_v13  ;;  %v2697_v19 = vmax.f32 %v2569_v11, 0.0  ;;  %v2761_v20 = vmax.f32 %v2633_v12, 0.0 }
 0x20d   : > { %v2634_v18 = vadd.f32 %v5196_v1, %v2499_v14 }
 0x20e   : > { %v2698_v21 = vmax.f32 %v2570_v17, 0.0 }
 0x20f   : > { %v2762_v22 = vmax.f32 %v2634_v18, 0.0  ;;  %v1651_v23 = vpop.f32.mrb[80].mxu0  ;;  %v1907_v24 = vpop.f32.mrb[80].mxu1 }
 0x210   : > { %v4092_v25 = vpack.c.bf16 %v2698_v21, %v2697_v19  ;;  %v2436_v27 = vmul.f32 %v5420_v63, %v1651_v23  ;;  %v2500_v28 = vmul.f32 %v5420_v63, %v1907_v24  ;;  %v1653_v1 = vpop.f32.mrb[81].mxu0  ;;  %v1909_v29 = vpop.f32.mrb[81].mxu1 }
 0x211   : > { %v4252_v26 = vpack.c.bf16 %v2762_v22, %v2761_v20  ;;  %v1654_v30 = vpop.f32.mrb[82].mxu0  ;;  %v1910_v31 = vpop.f32.mrb[82].mxu1 }
 0x212   : > { %4332 = vst [vmem:[%s5217_s22 + $0x98] sm:$0xff] %v4092_v25   ;;  %v2571_v33 = vadd.f32 %v5429_v32, %v2436_v27  ;;  %v2635_v34 = vadd.f32 %v5429_v32, %v2500_v28  ;;  %v2437_v35 = vmul.f32 %v5420_v63, %v1654_v30  ;;  %v2501_v36 = vmul.f32 %v5420_v63, %v1910_v31  ;;  %v1656_v37 = vpop.f32.mrb[83].mxu0  ;;  %v1912_v38 = vpop.f32.mrb[83].mxu1 }
 0x213   : > { %4364 = vst [vmem:[%s5217_s22 + $0x198] sm:$0xff] %v4252_v26  }
 0x214   : > { %v2572_v39 = vadd.f32 %v5429_v32, %v2437_v35  ;;  %v2636_v40 = vadd.f32 %v5429_v32, %v2501_v36  ;;  %v2699_v41 = vmax.f32 %v2571_v33, 0.0  ;;  %v2763_v42 = vmax.f32 %v2635_v34, 0.0 }
 0x216   : > { %v2700_v43 = vmax.f32 %v2572_v39, 0.0  ;;  %v2764_v44 = vmax.f32 %v2636_v40, 0.0 }
 0x217   : > { %v1659_v45 = vpop.f32.mrb[84].mxu0  ;;  %v1915_v46 = vpop.f32.mrb[84].mxu1 }
 0x218   : > { %v4097_v47 = vpack.c.bf16 %v2700_v43, %v2699_v41  ;;  %v4257_v48 = vpack.c.bf16 %v2764_v44, %v2763_v42  ;;  %v2438_v49 = vmul.f32 %v5420_v63, %v1659_v45  ;;  %v2502_v50 = vmul.f32 %v5420_v63, %v1915_v46  ;;  %v1661_v51 = vpop.f32.mrb[85].mxu0  ;;  %v1917_v52 = vpop.f32.mrb[85].mxu1 }
 0x219   : > { %v1662_v53 = vpop.f32.mrb[86].mxu0  ;;  %v1918_v54 = vpop.f32.mrb[86].mxu1 }
 0x21a   : > { %4333 = vst [vmem:[%s5217_s22 + $0xa0] sm:$0xff] %v4097_v47   ;;  %4365 = vst [vmem:[%s5217_s22 + $0x1a0] sm:$0xff] %v4257_v48   ;;  %v2573_v55 = vadd.f32 %v5429_v32, %v2438_v49  ;;  %v2637_v56 = vadd.f32 %v5429_v32, %v2502_v50  ;;  %v2439_v57 = vmul.f32 %v5420_v63, %v1662_v53  ;;  %v1664_v59 = vpop.f32.mrb[87].mxu0  ;;  %v1920_v60 = vpop.f32.mrb[87].mxu1 }
 0x21b   : > { %v2503_v58 = vmul.f32 %v5420_v63, %v1918_v54 }
 0x21c   : > { %v2574_v61 = vadd.f32 %v5429_v32, %v2439_v57  ;;  %v2701_v0 = vmax.f32 %v2573_v55, 0.0  ;;  %v2765_v2 = vmax.f32 %v2637_v56, 0.0 }
 0x21d   : > { %v2638_v62 = vadd.f32 %v5429_v32, %v2503_v58 }
 0x21e   : > { %v2702_v3 = vmax.f32 %v2574_v61, 0.0 }
 0x21f   : > { %v2766_v4 = vmax.f32 %v2638_v62, 0.0  ;;  %v1667_v5 = vpop.f32.mrb[88].mxu0  ;;  %v1923_v6 = vpop.f32.mrb[88].mxu1 }
 0x220   : > { %v4102_v7 = vpack.c.bf16 %v2702_v3, %v2701_v0  ;;  %v2440_v9 = vmul.f32 %v5420_v63, %v1667_v5  ;;  %v2504_v10 = vmul.f32 %v5420_v63, %v1923_v6  ;;  %v1669_v11 = vpop.f32.mrb[89].mxu0  ;;  %v1925_v12 = vpop.f32.mrb[89].mxu1 }
 0x221   : > { %v4262_v8 = vpack.c.bf16 %v2766_v4, %v2765_v2  ;;  %v1670_v13 = vpop.f32.mrb[90].mxu0  ;;  %v1926_v14 = vpop.f32.mrb[90].mxu1 }
 0x222   : > { %4334 = vst [vmem:[%s5217_s22 + $0xa8] sm:$0xff] %v4102_v7   ;;  %v2575_v15 = vadd.f32 %v5429_v32, %v2440_v9  ;;  %v2639_v16 = vadd.f32 %v5429_v32, %v2504_v10  ;;  %v2441_v17 = vmul.f32 %v5420_v63, %v1670_v13  ;;  %v2505_v18 = vmul.f32 %v5420_v63, %v1926_v14  ;;  %v1672_v19 = vpop.f32.mrb[91].mxu0  ;;  %v1928_v20 = vpop.f32.mrb[91].mxu1 }
 0x223   : > { %4366 = vst [vmem:[%s5217_s22 + $0x1a8] sm:$0xff] %v4262_v8  }
 0x224   : > { %v2576_v21 = vadd.f32 %v5429_v32, %v2441_v17  ;;  %v2640_v22 = vadd.f32 %v5429_v32, %v2505_v18  ;;  %v2703_v23 = vmax.f32 %v2575_v15, 0.0  ;;  %v2767_v24 = vmax.f32 %v2639_v16, 0.0 }
 0x226   : > { %v2704_v25 = vmax.f32 %v2576_v21, 0.0  ;;  %v2768_v26 = vmax.f32 %v2640_v22, 0.0 }
 0x227   : > { %v1675_v27 = vpop.f32.mrb[92].mxu0  ;;  %v1931_v28 = vpop.f32.mrb[92].mxu1 }
 0x228   : > { %v4107_v1 = vpack.c.bf16 %v2704_v25, %v2703_v23  ;;  %v4267_v29 = vpack.c.bf16 %v2768_v26, %v2767_v24  ;;  %v2442_v30 = vmul.f32 %v5420_v63, %v1675_v27  ;;  %v2506_v31 = vmul.f32 %v5420_v63, %v1931_v28  ;;  %v1677_v33 = vpop.f32.mrb[93].mxu0  ;;  %v1933_v34 = vpop.f32.mrb[93].mxu1 }
 0x229   : > { %v1678_v35 = vpop.f32.mrb[94].mxu0  ;;  %v1934_v36 = vpop.f32.mrb[94].mxu1 }
 0x22a   : > { %4335 = vst [vmem:[%s5217_s22 + $0xb0] sm:$0xff] %v4107_v1   ;;  %4367 = vst [vmem:[%s5217_s22 + $0x1b0] sm:$0xff] %v4267_v29   ;;  %v2577_v37 = vadd.f32 %v5429_v32, %v2442_v30  ;;  %v2641_v38 = vadd.f32 %v5429_v32, %v2506_v31  ;;  %v2443_v39 = vmul.f32 %v5420_v63, %v1678_v35  ;;  %v1680_v41 = vpop.f32.mrb[95].mxu0  ;;  %v1936_v42 = vpop.f32.mrb[95].mxu1 }
 0x22b   : > { %v2507_v40 = vmul.f32 %v5420_v63, %v1934_v36 }
 0x22c   : > { %v2578_v43 = vadd.f32 %v5429_v32, %v2443_v39  ;;  %v2705_v45 = vmax.f32 %v2577_v37, 0.0  ;;  %v2769_v46 = vmax.f32 %v2641_v38, 0.0 }
 0x22d   : > { %v2642_v44 = vadd.f32 %v5429_v32, %v2507_v40 }
 0x22e   : > { %v2706_v47 = vmax.f32 %v2578_v43, 0.0 }
 0x22f   : > { %v2770_v48 = vmax.f32 %v2642_v44, 0.0  ;;  %v1683_v49 = vpop.f32.mrb[96].mxu0  ;;  %v1939_v50 = vpop.f32.mrb[96].mxu1 }
 0x230   : > { %v4112_v51 = vpack.c.bf16 %v2706_v47, %v2705_v45  ;;  %v2444_v53 = vmul.f32 %v5420_v63, %v1683_v49  ;;  %v2508_v54 = vmul.f32 %v5420_v63, %v1939_v50  ;;  %v1685_v55 = vpop.f32.mrb[97].mxu0  ;;  %v1941_v56 = vpop.f32.mrb[97].mxu1 }
 0x231   : > { %v4272_v52 = vpack.c.bf16 %v2770_v48, %v2769_v46  ;;  %v1686_v57 = vpop.f32.mrb[98].mxu0  ;;  %v1942_v58 = vpop.f32.mrb[98].mxu1 }
 0x232   : > { %4336 = vst [vmem:[%s5217_s22 + $0xb8] sm:$0xff] %v4112_v51   ;;  %v2579_v59 = vadd.f32 %v5429_v32, %v2444_v53  ;;  %v2643_v60 = vadd.f32 %v5429_v32, %v2508_v54  ;;  %v2445_v61 = vmul.f32 %v5420_v63, %v1686_v57  ;;  %v2509_v62 = vmul.f32 %v5420_v63, %v1942_v58  ;;  %v1688_v0 = vpop.f32.mrb[99].mxu0  ;;  %v1944_v2 = vpop.f32.mrb[99].mxu1 }
 0x233   : > { %4368 = vst [vmem:[%s5217_s22 + $0x1b8] sm:$0xff] %v4272_v52  }
 0x234   : > { %v2580_v3 = vadd.f32 %v5429_v32, %v2445_v61  ;;  %v2644_v4 = vadd.f32 %v5429_v32, %v2509_v62  ;;  %v2707_v5 = vmax.f32 %v2579_v59, 0.0  ;;  %v2771_v6 = vmax.f32 %v2643_v60, 0.0 }
 0x236   : > { %v2708_v7 = vmax.f32 %v2580_v3, 0.0  ;;  %v2772_v8 = vmax.f32 %v2644_v4, 0.0 }
 0x237   : > { %v1691_v9 = vpop.f32.mrb[100].mxu0  ;;  %v1947_v10 = vpop.f32.mrb[100].mxu1 }
 0x238   : > { %v4117_v11 = vpack.c.bf16 %v2708_v7, %v2707_v5  ;;  %v4277_v12 = vpack.c.bf16 %v2772_v8, %v2771_v6  ;;  %v2446_v13 = vmul.f32 %v5420_v63, %v1691_v9  ;;  %v2510_v14 = vmul.f32 %v5420_v63, %v1947_v10  ;;  %v1693_v15 = vpop.f32.mrb[101].mxu0  ;;  %v1949_v16 = vpop.f32.mrb[101].mxu1 }
 0x239   : > { %v1694_v17 = vpop.f32.mrb[102].mxu0  ;;  %v1950_v18 = vpop.f32.mrb[102].mxu1 }
 0x23a   : > { %4337 = vst [vmem:[%s5217_s22 + $0xc0] sm:$0xff] %v4117_v11   ;;  %4369 = vst [vmem:[%s5217_s22 + $0x1c0] sm:$0xff] %v4277_v12   ;;  %v2581_v19 = vadd.f32 %v5429_v32, %v2446_v13  ;;  %v2645_v20 = vadd.f32 %v5429_v32, %v2510_v14  ;;  %v2447_v21 = vmul.f32 %v5420_v63, %v1694_v17  ;;  %v1696_v23 = vpop.f32.mrb[103].mxu0  ;;  %v1952_v24 = vpop.f32.mrb[103].mxu1 }
 0x23b   : > { %v2511_v22 = vmul.f32 %v5420_v63, %v1950_v18 }
 0x23c   : > { %v2582_v25 = vadd.f32 %v5429_v32, %v2447_v21  ;;  %v2709_v27 = vmax.f32 %v2581_v19, 0.0  ;;  %v2773_v28 = vmax.f32 %v2645_v20, 0.0 }
 0x23d   : > { %v2646_v26 = vadd.f32 %v5429_v32, %v2511_v22 }
 0x23e   : > { %v2710_v1 = vmax.f32 %v2582_v25, 0.0 }
 0x23f   : > { %v2774_v29 = vmax.f32 %v2646_v26, 0.0  ;;  %v1699_v30 = vpop.f32.mrb[104].mxu0  ;;  %v1955_v31 = vpop.f32.mrb[104].mxu1 }
 0x240   : > { %v4122_v33 = vpack.c.bf16 %v2710_v1, %v2709_v27  ;;  %v2448_v35 = vmul.f32 %v5420_v63, %v1699_v30  ;;  %v2512_v36 = vmul.f32 %v5420_v63, %v1955_v31  ;;  %v1701_v37 = vpop.f32.mrb[105].mxu0  ;;  %v1957_v38 = vpop.f32.mrb[105].mxu1 }
 0x241   : > { %v4282_v34 = vpack.c.bf16 %v2774_v29, %v2773_v28  ;;  %v1702_v39 = vpop.f32.mrb[106].mxu0  ;;  %v1958_v40 = vpop.f32.mrb[106].mxu1 }
 0x242   : > { %4338 = vst [vmem:[%s5217_s22 + $0xc8] sm:$0xff] %v4122_v33   ;;  %v2583_v41 = vadd.f32 %v5429_v32, %v2448_v35  ;;  %v2647_v42 = vadd.f32 %v5429_v32, %v2512_v36  ;;  %v2449_v43 = vmul.f32 %v5420_v63, %v1702_v39  ;;  %v2513_v44 = vmul.f32 %v5420_v63, %v1958_v40  ;;  %v1704_v45 = vpop.f32.mrb[107].mxu0  ;;  %v1960_v46 = vpop.f32.mrb[107].mxu1 }
 0x243   : > { %4370 = vst [vmem:[%s5217_s22 + $0x1c8] sm:$0xff] %v4282_v34  }
 0x244   : > { %v2584_v47 = vadd.f32 %v5429_v32, %v2449_v43  ;;  %v2648_v48 = vadd.f32 %v5429_v32, %v2513_v44  ;;  %v2711_v49 = vmax.f32 %v2583_v41, 0.0  ;;  %v2775_v50 = vmax.f32 %v2647_v42, 0.0 }
 0x246   : > { %v2712_v51 = vmax.f32 %v2584_v47, 0.0  ;;  %v2776_v52 = vmax.f32 %v2648_v48, 0.0 }
 0x247   : > { %v1707_v53 = vpop.f32.mrb[108].mxu0  ;;  %v1963_v54 = vpop.f32.mrb[108].mxu1 }
 0x248   : > { %v4127_v55 = vpack.c.bf16 %v2712_v51, %v2711_v49  ;;  %v4287_v56 = vpack.c.bf16 %v2776_v52, %v2775_v50  ;;  %v2450_v57 = vmul.f32 %v5420_v63, %v1707_v53  ;;  %v2514_v58 = vmul.f32 %v5420_v63, %v1963_v54  ;;  %v1709_v59 = vpop.f32.mrb[109].mxu0  ;;  %v1965_v60 = vpop.f32.mrb[109].mxu1 }
 0x249   : > { %v1710_v61 = vpop.f32.mrb[110].mxu0  ;;  %v1966_v62 = vpop.f32.mrb[110].mxu1 }
 0x24a   : > { %4339 = vst [vmem:[%s5217_s22 + $0xd0] sm:$0xff] %v4127_v55   ;;  %4371 = vst [vmem:[%s5217_s22 + $0x1d0] sm:$0xff] %v4287_v56   ;;  %v2585_v0 = vadd.f32 %v5429_v32, %v2450_v57  ;;  %v2649_v2 = vadd.f32 %v5429_v32, %v2514_v58  ;;  %v2451_v3 = vmul.f32 %v5420_v63, %v1710_v61  ;;  %v1712_v5 = vpop.f32.mrb[111].mxu0  ;;  %v1968_v6 = vpop.f32.mrb[111].mxu1 }
 0x24b   : > { %v2515_v4 = vmul.f32 %v5420_v63, %v1966_v62 }
 0x24c   : > { %v2586_v7 = vadd.f32 %v5429_v32, %v2451_v3  ;;  %v2713_v9 = vmax.f32 %v2585_v0, 0.0  ;;  %v2777_v10 = vmax.f32 %v2649_v2, 0.0 }
 0x24d   : > { %v2650_v8 = vadd.f32 %v5429_v32, %v2515_v4 }
 0x24e   : > { %v2714_v11 = vmax.f32 %v2586_v7, 0.0 }
 0x24f   : > { %v2778_v12 = vmax.f32 %v2650_v8, 0.0  ;;  %v1715_v13 = vpop.f32.mrb[112].mxu0  ;;  %v1971_v14 = vpop.f32.mrb[112].mxu1 }
 0x250   : > { %v4132_v15 = vpack.c.bf16 %v2714_v11, %v2713_v9  ;;  %v2452_v17 = vmul.f32 %v5420_v63, %v1715_v13  ;;  %v2516_v18 = vmul.f32 %v5420_v63, %v1971_v14  ;;  %v1717_v19 = vpop.f32.mrb[113].mxu0  ;;  %v1973_v20 = vpop.f32.mrb[113].mxu1 }
 0x251   : > { %v4292_v16 = vpack.c.bf16 %v2778_v12, %v2777_v10  ;;  %v1718_v21 = vpop.f32.mrb[114].mxu0  ;;  %v1974_v22 = vpop.f32.mrb[114].mxu1 }
 0x252   : > { %4340 = vst [vmem:[%s5217_s22 + $0xd8] sm:$0xff] %v4132_v15   ;;  %v2587_v23 = vadd.f32 %v5429_v32, %v2452_v17  ;;  %v2651_v24 = vadd.f32 %v5429_v32, %v2516_v18  ;;  %v2453_v25 = vmul.f32 %v5420_v63, %v1718_v21  ;;  %v2517_v26 = vmul.f32 %v5420_v63, %v1974_v22  ;;  %v1720_v27 = vpop.f32.mrb[115].mxu0  ;;  %v1976_v28 = vpop.f32.mrb[115].mxu1 }
 0x253   : > { %4372 = vst [vmem:[%s5217_s22 + $0x1d8] sm:$0xff] %v4292_v16  }
 0x254   : > { %v2588_v1 = vadd.f32 %v5429_v32, %v2453_v25  ;;  %v2652_v29 = vadd.f32 %v5429_v32, %v2517_v26  ;;  %v2715_v30 = vmax.f32 %v2587_v23, 0.0  ;;  %v2779_v31 = vmax.f32 %v2651_v24, 0.0 }
 0x256   : > { %v2716_v33 = vmax.f32 %v2588_v1, 0.0  ;;  %v2780_v34 = vmax.f32 %v2652_v29, 0.0 }
 0x257   : > { %v1723_v35 = vpop.f32.mrb[116].mxu0  ;;  %v1979_v36 = vpop.f32.mrb[116].mxu1 }
 0x258   : > { %v4137_v37 = vpack.c.bf16 %v2716_v33, %v2715_v30  ;;  %v4297_v38 = vpack.c.bf16 %v2780_v34, %v2779_v31  ;;  %v2454_v39 = vmul.f32 %v5420_v63, %v1723_v35  ;;  %v2518_v40 = vmul.f32 %v5420_v63, %v1979_v36  ;;  %v1725_v41 = vpop.f32.mrb[117].mxu0  ;;  %v1981_v42 = vpop.f32.mrb[117].mxu1 }
 0x259   : > { %v1726_v43 = vpop.f32.mrb[118].mxu0  ;;  %v1982_v44 = vpop.f32.mrb[118].mxu1 }
 0x25a   : > { %4341 = vst [vmem:[%s5217_s22 + $0xe0] sm:$0xff] %v4137_v37   ;;  %4373 = vst [vmem:[%s5217_s22 + $0x1e0] sm:$0xff] %v4297_v38   ;;  %v2589_v45 = vadd.f32 %v5429_v32, %v2454_v39  ;;  %v2653_v46 = vadd.f32 %v5429_v32, %v2518_v40  ;;  %v2455_v47 = vmul.f32 %v5420_v63, %v1726_v43  ;;  %v1728_v49 = vpop.f32.mrb[119].mxu0  ;;  %v1984_v50 = vpop.f32.mrb[119].mxu1 }
 0x25b   : > { %v2519_v48 = vmul.f32 %v5420_v63, %v1982_v44 }
 0x25c   : > { %v2590_v51 = vadd.f32 %v5429_v32, %v2455_v47  ;;  %v2717_v53 = vmax.f32 %v2589_v45, 0.0  ;;  %v2781_v54 = vmax.f32 %v2653_v46, 0.0 }
 0x25d   : > { %v2654_v52 = vadd.f32 %v5429_v32, %v2519_v48 }
 0x25e   : > { %v2718_v55 = vmax.f32 %v2590_v51, 0.0 }
 0x25f   : > { %v2782_v56 = vmax.f32 %v2654_v52, 0.0  ;;  %v1731_v57 = vpop.f32.mrb[120].mxu0  ;;  %v1987_v58 = vpop.f32.mrb[120].mxu1 }
 0x260   : > { %v4142_v59 = vpack.c.bf16 %v2718_v55, %v2717_v53  ;;  %v2456_v61 = vmul.f32 %v5420_v63, %v1731_v57  ;;  %v2520_v62 = vmul.f32 %v5420_v63, %v1987_v58  ;;  %v1733_v0 = vpop.f32.mrb[121].mxu0  ;;  %v1989_v2 = vpop.f32.mrb[121].mxu1 }
 0x261   : > { %v4302_v60 = vpack.c.bf16 %v2782_v56, %v2781_v54  ;;  %v1734_v3 = vpop.f32.mrb[122].mxu0  ;;  %v1990_v4 = vpop.f32.mrb[122].mxu1 }
 0x262   : > { %4342 = vst [vmem:[%s5217_s22 + $0xe8] sm:$0xff] %v4142_v59   ;;  %v2591_v5 = vadd.f32 %v5429_v32, %v2456_v61  ;;  %v2655_v6 = vadd.f32 %v5429_v32, %v2520_v62  ;;  %v2457_v7 = vmul.f32 %v5420_v63, %v1734_v3  ;;  %v2521_v8 = vmul.f32 %v5420_v63, %v1990_v4  ;;  %v1736_v9 = vpop.f32.mrb[123].mxu0  ;;  %v1992_v10 = vpop.f32.mrb[123].mxu1 }
 0x263   : > { %4374 = vst [vmem:[%s5217_s22 + $0x1e8] sm:$0xff] %v4302_v60  }
 0x264   : > { %v2592_v11 = vadd.f32 %v5429_v32, %v2457_v7  ;;  %v2656_v12 = vadd.f32 %v5429_v32, %v2521_v8  ;;  %v2719_v13 = vmax.f32 %v2591_v5, 0.0  ;;  %v2783_v14 = vmax.f32 %v2655_v6, 0.0 }
 0x266   : > { %v2720_v15 = vmax.f32 %v2592_v11, 0.0  ;;  %v2784_v16 = vmax.f32 %v2656_v12, 0.0 }
 0x267   : > { %v1739_v17 = vpop.f32.mrb[124].mxu0  ;;  %v1995_v18 = vpop.f32.mrb[124].mxu1 }
 0x268   : > { %v4147_v19 = vpack.c.bf16 %v2720_v15, %v2719_v13  ;;  %v4307_v20 = vpack.c.bf16 %v2784_v16, %v2783_v14  ;;  %v2458_v21 = vmul.f32 %v5420_v63, %v1739_v17  ;;  %v2522_v22 = vmul.f32 %v5420_v63, %v1995_v18  ;;  %v1741_v23 = vpop.f32.mrb[125].mxu0  ;;  %v1997_v24 = vpop.f32.mrb[125].mxu1 }
 0x269   : > { %v1742_v25 = vpop.f32.mrb[126].mxu0  ;;  %v1998_v26 = vpop.f32.mrb[126].mxu1 }
 0x26a   : > { %4343 = vst [vmem:[%s5217_s22 + $0xf0] sm:$0xff] %v4147_v19   ;;  %4375 = vst [vmem:[%s5217_s22 + $0x1f0] sm:$0xff] %v4307_v20   ;;  %v2593_v27 = vadd.f32 %v5429_v32, %v2458_v21  ;;  %v2657_v28 = vadd.f32 %v5429_v32, %v2522_v22  ;;  %v2459_v1 = vmul.f32 %v5420_v63, %v1742_v25  ;;  %v1744_v30 = vpop.f32.mrb[127].mxu0  ;;  %v2000_v31 = vpop.f32.mrb[127].mxu1 }
 0x26b   : > { %v2523_v29 = vmul.f32 %v5420_v63, %v1998_v26 }
 0x26c   : > { %v2594_v33 = vadd.f32 %v5429_v32, %v2459_v1  ;;  %v2721_v35 = vmax.f32 %v2593_v27, 0.0  ;;  %v2785_v36 = vmax.f32 %v2657_v28, 0.0 }
 0x26d   : > { %v2658_v34 = vadd.f32 %v5429_v32, %v2523_v29 }
 0x26e   : > { %v2722_v37 = vmax.f32 %v2594_v33, 0.0 }
 0x26f   : > { %v2786_v38 = vmax.f32 %v2658_v34, 0.0 }
 0x270   : > { %v4152_v63 = vpack.c.bf16 %v2722_v37, %v2721_v35 }
 0x271   : > { %v4312_v39 = vpack.c.bf16 %v2786_v38, %v2785_v36 }
 0x272   : > { %4344 = vst [vmem:[%s5217_s22 + $0xf8] sm:$0xff] %v4152_v63  }
 0x273   : > { %4376 = vst [vmem:[%s5217_s22 + $0x1f8] sm:$0xff] %v4312_v39  }
 0x274   : > { %4770 = shalt.err (!%p4767_p5)
}
 0x275   : > { %s4771_s21 = scalar_lea.hbm %s5552_s29, 8192  ;;  %s4775_s13 = scalar_lea.hbm %s5609_s4, 16384 }
 0x276   : > { %p4772_p9 = scmp.ne.s32.totalorder %s5552_s29, %s4771_s21  ;;  %p4776_p3 = scmp.lt.u32.totalorder %s5552_s29, %s5609_s4 }
 0x277   : > { %p4777_p7 = scmp.lt.u32.totalorder %s4775_s13, %s4771_s21  ;;  %p4779_p4 = scmp.lt.u32.totalorder %s4771_s21, %s5552_s29 }
 0x278   : > { %p4773_p1 = pnand %p4772_p9, %p4976_p10 }
 0x279   : > { %p4778_p13 = por %p4777_p7, %p4776_p3 }
 0x27a   : > { %p4774_p2 = pneg %p4773_p1 }
 0x27b   : > { %p4780_p6 = por %p4779_p4, %p4778_p13 }
 0x27d   : > { %p4781_p8 = pnand %p4780_p6, %p4774_p2 }
 0x27f   : > { %4784 = shalt.err (!%p4781_p8)
}
 0x280   : > { %s4853_s6 = smov 64   ;;  %s4854_s11 = smov 4  }
 0x281   : > { %4415 = dma.vmem_to_hbm [thread:$0]  (%p4976_p10), %s5554_s9, 8192, %s5552_s29, %s3428_s18, %s4853_s6, %s4853_s6, %s4854_s11  }
 0x282 PF: > { %s3457_s12 = sand.u32 1, %s4823_s15   ;;  %p5627_p12 = scmp.ne.s32.totalorder %s5617_s26, 0 }
 0x283   : > { %p5628_p11 = scmp.ge.s32.totalorder %s4843_s20, 2  ;;  %s3458_s23 = scalar_lea.sflag [#allocation5], %s3457_s12 }
 0x285   : > { %p4426_p0 = pnand %p5628_p11, %p5627_p12 }
 0x287   : > { %4818 = dma.done.wait (!%p4426_p0), %s3458_s23, 8192  }
 0x288   : > { %4820 = vsyncadd (!%p4426_p0), %s3458_s23, 4294959104  ;;  %s21_s20 = sadd.s32 1, %s4843_s20   ;;  %s5629_s15 = smov %s4827_s16 }
 0x289   : > { %p18_p5 = scmp.ge.s32.totalorder %s21_s20, 4   ;;  %s5630_s16 = smov %s4831_s17 }
 0x28a   : > { %s5631_s17 = smov %s4985_s10  ;;  %s5632_s18 = smov %s4839_s19 }
 0x28b   : > { %s5633_s19 = smov %s5635_s5  ;;  %20 = sbr.rel (!%p18_p5) target bundleno = 7 (0x7), region = 100 }
 0x292   :  { %3463 = vsyncpa [#allocation4], 1 }
 0x293   :  { %3465 = vsyncpa [#allocation4 + $0x1], 1 }
 0x294   :  { %3466 = vsyncpa [#allocation7], 1 }
 0x295   :  { %3467 = vsyncpa [#allocation5], 1 }
 0x296   :  { %3469 = vsyncpa [#allocation5 + $0x1], 1 }

</bundles_post_ra>
